<compile_context>
chip_gen: v6e
topology: v6e:2x2x1
jax: 0.10.0
libtpu: 0.0.40
codegen_flags: <defaults>
</compile_context>

<pallas_src>
import functools

import jax
import jax.numpy as jnp
from jax.experimental import pallas as pl
from jax.experimental.pallas import tpu as pltpu

LANE = 128


def _round_up(n, m):
    return (n + m - 1) // m * m


def _mlp_kernel(x_ref, w1_ref, w2_ref, w3_ref, w4_ref, b_ref, out_ref, *,
                in_size, out_size):
    """Fused 4-layer MLP forward on one batch tile (all operands in VMEM)."""
    x = x_ref[...]  # (TB, in_size) float32

    # ---- Layer 1 ----------------------------------------------------------
    if in_size <= 8:
        # K is tiny: do it on the VPU as broadcast FMAs (the MXU pass would be
        # ~2% utilized and sits at the head of a 4-deep serial matmul chain).
        h = x[:, 0:1] * w1_ref[0:1, :]
        for j in range(1, in_size):
            h = h + x[:, j:j + 1] * w1_ref[j:j + 1, :]
        h = h + b_ref[0:1, :]
    else:
        h = jnp.dot(x, w1_ref[...], preferred_element_type=jnp.float32) + b_ref[0:1, :]
    h = jnp.maximum(h, 0.0)

    # ---- Layers 2-3 (hidden, ReLU) ----------------------------------------
    h = jnp.dot(h, w2_ref[...], preferred_element_type=jnp.float32) + b_ref[1:2, :]
    h = jnp.maximum(h, 0.0)

    h = jnp.dot(h, w3_ref[...], preferred_element_type=jnp.float32) + b_ref[2:3, :]
    h = jnp.maximum(h, 0.0)

    # ---- Layer 4 (output) --------------------------------------------------
    y = jnp.dot(h, w4_ref[...], preferred_element_type=jnp.float32) + b_ref[3:4, :]

    # Store only the real output columns (lane-padded columns never reach HBM).
    out_ref[...] = y[:, :out_size].astype(out_ref.dtype)


def prepare_params(params, in_size):
    """One-time (outside the hot path) zero-padding of layer widths to 128
    lanes and stacking of biases into a single (num_layers, 128) operand.

    params: list of (W, b); W: [in, out], b: [1, out] (W is the transpose of
            torch.nn.Linear.weight, so y = x @ W + b).
    Returns (w1, w2, w3, w4, b_stack) device arrays.
    """
    padded_widths = [_round_up(w.shape[1], LANE) for (w, _) in params]
    max_w = max(padded_widths)

    padded_ws = []
    bias_rows = []
    prev = in_size  # layer 1 keeps the raw in_size so x is not inflated
    for (w, b), out_p in zip(params, padded_widths):
        wp = jnp.zeros((prev, out_p), jnp.float32)
        wp = wp.at[: w.shape[0], : w.shape[1]].set(w.astype(jnp.float32))
        bp = jnp.zeros((max_w,), jnp.float32)
        bp = bp.at[: w.shape[1]].set(b.reshape(-1).astype(jnp.float32))
        padded_ws.append(wp)
        bias_rows.append(bp)
        prev = out_p

    b_stack = jnp.stack(bias_rows, axis=0)  # (num_layers, 128)
    w1, w2, w3, w4 = padded_ws
    return w1, w2, w3, w4, b_stack


@functools.partial(jax.jit, static_argnames=("out_size", "tb"))
def base_network_forward(x, prepared, *, out_size, tb=1024):
    """Fused BaseNetwork forward as a single batch-tiled Pallas call.

    x:        [B, input_size] float32
    prepared: output of prepare_params (padded weights + stacked biases)
    """
    B, in_size = x.shape
    w1, w2, w3, w4, b_stack = prepared

    # Batch tile: multiple of 8 sublanes; capped so there are >= 2 grid steps
    # (lets dimension_semantics=("parallel",) shard across both v7x TCs).
    tb = max(8, min(tb, _round_up(max(1, (B + 1) // 2), 8)))
    grid = (pl.cdiv(B, tb),)  # ragged last block handled by Pallas masking

    def const_spec(a):
        # Full-array block, constant index_map -> operand stays VMEM-resident
        # across all grid steps (no re-DMA of weights/biases).
        return pl.BlockSpec(a.shape, lambda i, _n=a.ndim: (0,) * _n)

    in_specs = [
        pl.BlockSpec((tb, in_size), lambda i: (i, 0)),  # x tile (streamed)
        const_spec(w1),
        const_spec(w2),
        const_spec(w3),
        const_spec(w4),
        const_spec(b_stack),
    ]
    out_specs = pl.BlockSpec((tb, out_size), lambda i: (i, 0))

    kernel = functools.partial(_mlp_kernel, in_size=in_size, out_size=out_size)

    return pl.pallas_call(
        kernel,
        out_shape=jax.ShapeDtypeStruct((B, out_size), jnp.float32),
        grid=grid,
        in_specs=in_specs,
        out_specs=out_specs,
        compiler_params=pltpu.CompilerParams(
            dimension_semantics=("parallel",),   # megacore-shard batch on v7x
            vmem_limit_bytes=32 << 20,           # far above actual use (~few MiB)
        ),
    )(x, w1, w2, w3, w4, b_stack)


def init_params(key, input_size=3, output_size=2, hidden_sizes=(32, 32, 32)):
    """nn.Linear default init: U(-1/sqrt(fan_in), +1/sqrt(fan_in))."""
    layer_sizes = [input_size] + list(hidden_sizes) + [output_size]
    params = []
    for i in range(len(layer_sizes) - 1):
        fan_in, fan_out = layer_sizes[i], layer_sizes[i + 1]
        key, kw, kb = jax.random.split(key, 3)
        bound = 1.0 / jnp.sqrt(jnp.float32(fan_in))
        # Stored [in, out] (transposed vs PyTorch's [out, in]).
        w = jax.random.uniform(kw, (fan_in, fan_out), jnp.float32, -bound, bound)
        b = jax.random.uniform(kb, (1, fan_out), jnp.float32, -bound, bound)
        params.append((w, b))
    return params


def reference_forward(x, params):
    """Plain-JAX reference (full f32 precision) for correctness checking."""
    h = x
    n = len(params)
    for i, (w, b) in enumerate(params):
        h = jnp.dot(h, w, precision=jax.lax.Precision.HIGHEST) + b
        if i < n - 1:
            h = jnp.maximum(h, 0.0)  # ReLU between hidden layers
    return h


if __name__ == "__main__":
    key = jax.random.PRNGKey(0)
    k_x, k_p = jax.random.split(key)

    INPUT_SIZE = 3
    OUTPUT_SIZE = 2
    HIDDEN = (32, 32, 32)
    BATCH = 600           # not a multiple of the tile -> exercises ragged block
    TILE_B = 1024         # capped internally so the grid keeps >= 2 steps

    x = jax.random.normal(k_x, (BATCH, INPUT_SIZE), jnp.float32)
    params = init_params(k_p, INPUT_SIZE, OUTPUT_SIZE, HIDDEN)
    prepared = prepare_params(params, INPUT_SIZE)   # one-time, outside hot path

    out = base_network_forward(x, prepared, out_size=OUTPUT_SIZE, tb=TILE_B)
    out = jax.block_until_ready(out)

    ref = reference_forward(x, params)
    assert out.shape == (BATCH, OUTPUT_SIZE), out.shape
    assert jnp.allclose(out, ref, atol=1e-4, rtol=1e-4), (
        f"mismatch vs reference: max abs err = {jnp.max(jnp.abs(out - ref))}"
    )

    print("KERNEL_OK")
</pallas_src>

<mosaic_0001>
module attributes {stable_mosaic.version = 11 : i64} {
  func.func @_mlp_kernel(%arg0: i32, %arg1: memref<304x3xf32, #tpu.memory_space<vmem>>, %arg2: memref<3x128xf32, #tpu.memory_space<vmem>>, %arg3: memref<128x128xf32, #tpu.memory_space<vmem>>, %arg4: memref<128x128xf32, #tpu.memory_space<vmem>>, %arg5: memref<128x128xf32, #tpu.memory_space<vmem>>, %arg6: memref<4x128xf32, #tpu.memory_space<vmem>>, %arg7: memref<304x2xf32, #tpu.memory_space<vmem>>) attributes {dimension_semantics = [#tpu.dimension_semantics<parallel>], iteration_bounds = array<i64: 2>, scalar_prefetch = 0 : i64, scratch_operands = 0 : i64, tpu.core_type = #tpu.core_type<tc>, window_params = [{transform_indices = @transform_0, window_bounds = array<i64: 304, 3>}, {pipeline_mode = #tpu.pipeline_mode<synchronous>, transform_indices = @transform_1, window_bounds = array<i64: 3, 128>}, {pipeline_mode = #tpu.pipeline_mode<synchronous>, transform_indices = @transform_2, window_bounds = array<i64: 128, 128>}, {pipeline_mode = #tpu.pipeline_mode<synchronous>, transform_indices = @transform_3, window_bounds = array<i64: 128, 128>}, {pipeline_mode = #tpu.pipeline_mode<synchronous>, transform_indices = @transform_4, window_bounds = array<i64: 128, 128>}, {pipeline_mode = #tpu.pipeline_mode<synchronous>, transform_indices = @transform_5, window_bounds = array<i64: 4, 128>}, {transform_indices = @transform_6, window_bounds = array<i64: 304, 2>}]} {
    %c0 = arith.constant 0 : index
    %c0_0 = arith.constant 0 : index
    %0 = vector.load %arg1[%c0, %c0_0] : memref<304x3xf32, #tpu.memory_space<vmem>>, vector<304x3xf32>
    %1 = vector.extract_strided_slice %0 {offsets = [0, 0], sizes = [304, 1], strides = [1, 1]} : vector<304x3xf32> to vector<304x1xf32>
    %c0_1 = arith.constant 0 : index
    %c0_2 = arith.constant 0 : index
    %2 = vector.load %arg2[%c0_1, %c0_2] : memref<3x128xf32, #tpu.memory_space<vmem>>, vector<1x128xf32>
    %3 = vector.broadcast %1 : vector<304x1xf32> to vector<304x128xf32>
    %4 = vector.broadcast %2 : vector<1x128xf32> to vector<304x128xf32>
    %5 = arith.mulf %3, %4 : vector<304x128xf32>
    %6 = vector.extract_strided_slice %0 {offsets = [0, 1], sizes = [304, 1], strides = [1, 1]} : vector<304x3xf32> to vector<304x1xf32>
    %c1 = arith.constant 1 : index
    %c0_3 = arith.constant 0 : index
    %7 = vector.load %arg2[%c1, %c0_3] : memref<3x128xf32, #tpu.memory_space<vmem>>, vector<1x128xf32>
    %8 = vector.broadcast %6 : vector<304x1xf32> to vector<304x128xf32>
    %9 = vector.broadcast %7 : vector<1x128xf32> to vector<304x128xf32>
    %10 = arith.mulf %8, %9 : vector<304x128xf32>
    %11 = arith.addf %5, %10 : vector<304x128xf32>
    %12 = vector.extract_strided_slice %0 {offsets = [0, 2], sizes = [304, 1], strides = [1, 1]} : vector<304x3xf32> to vector<304x1xf32>
    %c2 = arith.constant 2 : index
    %c0_4 = arith.constant 0 : index
    %13 = vector.load %arg2[%c2, %c0_4] : memref<3x128xf32, #tpu.memory_space<vmem>>, vector<1x128xf32>
    %14 = vector.broadcast %12 : vector<304x1xf32> to vector<304x128xf32>
    %15 = vector.broadcast %13 : vector<1x128xf32> to vector<304x128xf32>
    %16 = arith.mulf %14, %15 : vector<304x128xf32>
    %17 = arith.addf %11, %16 : vector<304x128xf32>
    %c0_5 = arith.constant 0 : index
    %c0_6 = arith.constant 0 : index
    %18 = vector.load %arg6[%c0_5, %c0_6] : memref<4x128xf32, #tpu.memory_space<vmem>>, vector<1x128xf32>
    %19 = vector.broadcast %18 : vector<1x128xf32> to vector<304x128xf32>
    %20 = arith.addf %17, %19 : vector<304x128xf32>
    %cst = arith.constant 0.000000e+00 : f32
    %21 = vector.broadcast %cst : f32 to vector<304x128xf32>
    %22 = arith.maximumf %20, %21 : vector<304x128xf32>
    %c0_7 = arith.constant 0 : index
    %c0_8 = arith.constant 0 : index
    %23 = vector.load %arg3[%c0_7, %c0_8] : memref<128x128xf32, #tpu.memory_space<vmem>>, vector<128x128xf32>
    %cst_9 = arith.constant dense<0.000000e+00> : vector<304x128xf32>
    %24 = tpu.matmul %22, %23, %cst_9 {dimension_numbers = #tpu.dot_dimension_numbers<[1], [0], [0], [1], [0, 0, 1, 1], [], []>} : vector<304x128xf32>, vector<128x128xf32>, vector<304x128xf32> -> vector<304x128xf32>
    %c1_10 = arith.constant 1 : index
    %c0_11 = arith.constant 0 : index
    %25 = vector.load %arg6[%c1_10, %c0_11] : memref<4x128xf32, #tpu.memory_space<vmem>>, vector<1x128xf32>
    %26 = vector.broadcast %25 : vector<1x128xf32> to vector<304x128xf32>
    %27 = arith.addf %24, %26 : vector<304x128xf32>
    %cst_12 = arith.constant 0.000000e+00 : f32
    %28 = vector.broadcast %cst_12 : f32 to vector<304x128xf32>
    %29 = arith.maximumf %27, %28 : vector<304x128xf32>
    %c0_13 = arith.constant 0 : index
    %c0_14 = arith.constant 0 : index
    %30 = vector.load %arg4[%c0_13, %c0_14] : memref<128x128xf32, #tpu.memory_space<vmem>>, vector<128x128xf32>
    %cst_15 = arith.constant dense<0.000000e+00> : vector<304x128xf32>
    %31 = tpu.matmul %29, %30, %cst_15 {dimension_numbers = #tpu.dot_dimension_numbers<[1], [0], [0], [1], [0, 0, 1, 1], [], []>} : vector<304x128xf32>, vector<128x128xf32>, vector<304x128xf32> -> vector<304x128xf32>
    %c2_16 = arith.constant 2 : index
    %c0_17 = arith.constant 0 : index
    %32 = vector.load %arg6[%c2_16, %c0_17] : memref<4x128xf32, #tpu.memory_space<vmem>>, vector<1x128xf32>
    %33 = vector.broadcast %32 : vector<1x128xf32> to vector<304x128xf32>
    %34 = arith.addf %31, %33 : vector<304x128xf32>
    %cst_18 = arith.constant 0.000000e+00 : f32
    %35 = vector.broadcast %cst_18 : f32 to vector<304x128xf32>
    %36 = arith.maximumf %34, %35 : vector<304x128xf32>
    %c0_19 = arith.constant 0 : index
    %c0_20 = arith.constant 0 : index
    %37 = vector.load %arg5[%c0_19, %c0_20] : memref<128x128xf32, #tpu.memory_space<vmem>>, vector<128x128xf32>
    %cst_21 = arith.constant dense<0.000000e+00> : vector<304x128xf32>
    %38 = tpu.matmul %36, %37, %cst_21 {dimension_numbers = #tpu.dot_dimension_numbers<[1], [0], [0], [1], [0, 0, 1, 1], [], []>} : vector<304x128xf32>, vector<128x128xf32>, vector<304x128xf32> -> vector<304x128xf32>
    %c3 = arith.constant 3 : index
    %c0_22 = arith.constant 0 : index
    %39 = vector.load %arg6[%c3, %c0_22] : memref<4x128xf32, #tpu.memory_space<vmem>>, vector<1x128xf32>
    %40 = vector.broadcast %39 : vector<1x128xf32> to vector<304x128xf32>
    %41 = arith.addf %38, %40 : vector<304x128xf32>
    %42 = vector.extract_strided_slice %41 {offsets = [0, 0], sizes = [304, 2], strides = [1, 1]} : vector<304x128xf32> to vector<304x2xf32>
    %c0_23 = arith.constant 0 : index
    %c0_24 = arith.constant 0 : index
    %43 = vector.load %arg7[%c0_23, %c0_24] : memref<304x2xf32, #tpu.memory_space<vmem>>, vector<304x2xf32>
    tpu.vector_store %arg7[%c0_23, %c0_24], %42 {strides = array<i32>} : memref<304x2xf32, #tpu.memory_space<vmem>>, vector<304x2xf32>,
    return
  }
  func.func @transform_0(%arg0: i32) -> (i32, i32) {
    %c0_i32 = arith.constant 0 : i32
    %c0_i32_0 = arith.constant 0 : i32
    return %arg0, %c0_i32 : i32, i32
  }
  func.func @transform_1(%arg0: i32) -> (i32, i32) {
    %c0_i32 = arith.constant 0 : i32
    %c0_i32_0 = arith.constant 0 : i32
    %c0_i32_1 = arith.constant 0 : i32
    return %c0_i32, %c0_i32_0 : i32, i32
  }
  func.func @transform_2(%arg0: i32) -> (i32, i32) {
    %c0_i32 = arith.constant 0 : i32
    %c0_i32_0 = arith.constant 0 : i32
    %c0_i32_1 = arith.constant 0 : i32
    return %c0_i32, %c0_i32_0 : i32, i32
  }
  func.func @transform_3(%arg0: i32) -> (i32, i32) {
    %c0_i32 = arith.constant 0 : i32
    %c0_i32_0 = arith.constant 0 : i32
    %c0_i32_1 = arith.constant 0 : i32
    return %c0_i32, %c0_i32_0 : i32, i32
  }
  func.func @transform_4(%arg0: i32) -> (i32, i32) {
    %c0_i32 = arith.constant 0 : i32
    %c0_i32_0 = arith.constant 0 : i32
    %c0_i32_1 = arith.constant 0 : i32
    return %c0_i32, %c0_i32_0 : i32, i32
  }
  func.func @transform_5(%arg0: i32) -> (i32, i32) {
    %c0_i32 = arith.constant 0 : i32
    %c0_i32_0 = arith.constant 0 : i32
    %c0_i32_1 = arith.constant 0 : i32
    return %c0_i32, %c0_i32_0 : i32, i32
  }
  func.func @transform_6(%arg0: i32) -> (i32, i32) {
    %c0_i32 = arith.constant 0 : i32
    %c0_i32_0 = arith.constant 0 : i32
    return %arg0, %c0_i32 : i32, i32
  }
}

</mosaic_0001>

<bundles_post_ra>
// kernel: base_network_forward.1
= control target key start
LH: loop header
LB: loop body
LE: loop exit
PB: predicated region body
PF: predicated region fallthrough
CT: control target
= control target key end

     0   :  { %s3174_s21 = smov 0   ;;  %s3176_s22 = smov 0   ;;  %s4143_s0 = inlined_call_operand.vmem [shape: f32[600,3], index: 0, kind: input, shape index: {}]   ;;  %s4144_s1 = inlined_call_operand.vmem [shape: f32[3,128], index: 1, kind: input, shape index: {}]   ;;  %s4145_s2 = inlined_call_operand.vmem [shape: f32[128,128], index: 2, kind: input, shape index: {}]   ;;  %s4146_s3 = inlined_call_operand.vmem [shape: f32[128,128], index: 3, kind: input, shape index: {}]   ;;  %s4147_s4 = inlined_call_operand.vmem [shape: f32[128,128], index: 4, kind: input, shape index: {}]   ;;  %s4148_s5 = inlined_call_operand.vmem [shape: f32[4,128], index: 5, kind: input, shape index: {}]   ;;  %s4149_s6 = inlined_call_operand.vmem [shape: f32[600,2], index: 6, kind: output, shape index: {}]  }
   0x1   :  { %s3178_s23 = smov 0  }
   0x2 LB: > { %s3187_s24 = sadd.s32 4294967295, %s3102_s23   ;;  %s3189_s25 = sadd.s32 1, %s3102_s23   ;;  %s3102_s23 = sphi %s3178_s23, %s4158_s23   ;;  %s3098_s22 = sphi %s3176_s22, %s4157_s22   ;;  %s3094_s21 = sphi %s3174_s21, %s4156_s21  }
   0x3   : > { %s151_s26 = ssub.s32 %s3102_s23, %s3189_s25  ;;  %s154_s27 = sadd.s32 1, %s3098_s22 }
   0x4   : > { %p152_p0 = scmp.eq.s32.totalorder %s151_s26, 0  ;;  %p164_p1 = scmp.ne.s32.totalorder %s3098_s22, %s3094_s21 }
   0x5   : > { %p165_p2 = scmp.eq.s32.totalorder %s3187_s24, 1  ;;  %p2403_p3 = scmp.ge.s32.totalorder %s3102_s23, 1 }
   0x6   : > { %s3197_s28 = scalar_select %p152_p0, %s3098_s22, %s154_s27  }
   0x7   : > { %p3199_p4 = por %p165_p2, %p164_p1  ;;  %p221_p5 = scmp.lt.s32.totalorder %s3102_s23, 3 }
   0x9   : > { %p222_p6 = pnand %p2403_p3, %p221_p5 }
   0xa   : > { %s3204_s30 = smul.u32 (!%p222_p6), 38, %s3187_s24 }
   0xb   : > { %225 = sbr.rel (%p222_p6) target bundleno = 1169 (0x491), region = 44 }
   0xc   : > { %p259_p7 = scmp.lt.s32.totalorder (!%p222_p6), %s3204_s30, 74 }
  0x10   : > { %v3136_v0 = vmov 0   ;;  %s260_s7 = scalar_select %p259_p7, %s3204_s30, 74  ;;  %v3137_v3 = vmov 1   ;;  %v3138_v5 = vmov 2   ;;  %v1106_v20 = vld [vmem:[%s4145_s2 + $0x78] sm:$0xff]  ;;  %v1105_v22 = vld [vmem:[%s4145_s2 + $0x70] sm:$0xff] }
  0x11   : > { %2981 = vset.pattern.permute.xlu1 %v3136_v0  ;;  %2979 = vset.pattern.permute.xlu0 %v3136_v0  ;;  %v1104_v23 = vld [vmem:[%s4145_s2 + $0x68] sm:$0xff]  ;;  %v1103_v25 = vld [vmem:[%s4145_s2 + $0x60] sm:$0xff]  ;;  %v1102_v26 = vld [vmem:[%s4145_s2 + $0x58] sm:$0xff]  ;;  %vm1995_vm0 = vcmask 15360   ;;  %s2042_s15 = ssub.s32 (%p3199_p4), 75, %s3204_s30  ;;  %s2424_s16 = smul.u32 (%p3199_p4), 304, %s3187_s24 }
  0x12   : > { %s2404_s8 = sshll.u32 %s260_s7, 3  ;;  %2587 = vmatprep.subr.mxu0 %v1106_v20  ;;  %2854 = vmatprep.subr.mxu1 %v1106_v20  ;;  %v1101_v28 = vld [vmem:[%s4145_s2 + $0x50] sm:$0xff]  ;;  %v1100_v30 = vld [vmem:[%s4145_s2 + $0x48] sm:$0xff]  ;;  %v1099_v32 = vld [vmem:[%s4145_s2 + $0x40] sm:$0xff]  ;;  %p2043_p8 = scmp.lt.s32.totalorder (%p3199_p4), %s2042_s15, 38 }
  0x13   : > { %s3213_s11 = scalar_lea.vmem %s4143_s0, %s2404_s8  ;;  %2588 = vmatpush3.msra.mxu0 %v1106_v20  ;;  %2870 = vmatpush3.msra.mxu1 %v1106_v20  ;;  %v1098_v34 = vld [vmem:[%s4145_s2 + $0x38] sm:$0xff]  ;;  %v1097_v35 = vld [vmem:[%s4145_s2 + $0x30] sm:$0xff]  ;;  %v1096_v37 = vld [vmem:[%s4145_s2 + $0x28] sm:$0xff]  ;;  %s4001_s19 = scalar_lea.vmem (%p3199_p4), %s4149_s6, %s2424_s16  }
  0x14   : > { %v3216_v1 = vld [vmem:[%s3213_s11 + $0x8] sm:$0xff]  ;;  %v273_v2 = vld [vmem:[%s3213_s11] sm:$0xff]  ;;  %v3224_v4 = vld [vmem:[%s3213_s11 + $0x18] sm:$0xff]  ;;  %2589 = vmatprep.subr.mxu0 %v1105_v22  ;;  %2855 = vmatprep.subr.mxu1 %v1105_v22 }
  0x15   : > { %319 = vperm.xlu1 %2981, %v3216_v1   ;;  %314 = vperm.xlu0 %2979, %v273_v2   ;;  %v3230_v6 = vld [vmem:[%s3213_s11 + $0x28] sm:$0xff]  ;;  %v275_v7 = vld [vmem:[%s3213_s11 + $0x10] sm:$0xff]  ;;  %v3236_v8 = vld [vmem:[%s3213_s11 + $0x38] sm:$0xff] }
  0x16   : > { %v3241_v9 = vld [vmem:[%s3213_s11 + $0x48] sm:$0xff]  ;;  %v3245_v10 = vld [vmem:[%s3213_s11 + $0x58] sm:$0xff]  ;;  %v277_v12 = vld [vmem:[%s3213_s11 + $0x20] sm:$0xff]  ;;  %2590 = vmatpush3.msra.mxu0 %v1105_v22  ;;  %2871 = vmatpush3.msra.mxu1 %v1105_v22 }
  0x17   : > { %v3250_v11 = vld [vmem:[%s3213_s11 + $0x68] sm:$0xff]  ;;  %v3256_v13 = vld [vmem:[%s3213_s11 + $0x78] sm:$0xff]  ;;  %v279_v18 = vld [vmem:[%s3213_s11 + $0x30] sm:$0xff]  ;;  %2591 = vmatprep.subr.mxu0 %v1104_v23  ;;  %2856 = vmatprep.subr.mxu1 %v1104_v23 }
  0x18   : > { %v3261_v14 = vld [vmem:[%s3213_s11 + $0x88] sm:$0xff]  ;;  %v3266_v15 = vld [vmem:[%s3213_s11 + $0x98] sm:$0xff]  ;;  %2592 = vmatpush3.msra.mxu0 %v1104_v23  ;;  %2872 = vmatpush3.msra.mxu1 %v1104_v23  ;;  %v281_v31 = vld [vmem:[%s3213_s11 + $0x40] sm:$0xff] }
  0x19   : > { %2982 = vset.pattern.permute.xlu1 %v3137_v3  ;;  %2980 = vset.pattern.permute.xlu0 %v3137_v3  ;;  %v3271_v16 = vld [vmem:[%s3213_s11 + $0xa8] sm:$0xff]  ;;  %v3276_v17 = vld [vmem:[%s3213_s11 + $0xb8] sm:$0xff]  ;;  %v1095_v38 = vld [vmem:[%s4145_s2 + $0x20] sm:$0xff] }
  0x1a   : > { %550 = vperm.xlu1 %2982, %v3216_v1   ;;  %546 = vperm.xlu0 %2980, %v273_v2   ;;  %v3281_v19 = vld [vmem:[%s3213_s11 + $0xc8] sm:$0xff]  ;;  %v3289_v21 = vld [vmem:[%s3213_s11 + $0xd8] sm:$0xff]  ;;  %v1093_v40 = vld [vmem:[%s4145_s2 + $0x10] sm:$0xff] }
  0x1b   : > { %v3300_v24 = vld [vmem:[%s3213_s11 + $0xe8] sm:$0xff]  ;;  %v3311_v27 = vld [vmem:[%s3213_s11 + $0xf8] sm:$0xff]  ;;  %2593 = vmatprep.subr.mxu0 %v1103_v25  ;;  %2857 = vmatprep.subr.mxu1 %v1103_v25  ;;  %v1091_v42 = vld [vmem:[%s4145_s2] sm:$0xff] }
  0x1c   : > { %2594 = vmatpush3.msra.mxu0 %v1103_v25  ;;  %2873 = vmatpush3.msra.mxu1 %v1103_v25  ;;  %v3319_v29 = vld [vmem:[%s3213_s11 + $0x108] sm:$0xff]  ;;  %v3331_v33 = vld [vmem:[%s3213_s11 + $0x118] sm:$0xff]  ;;  %v283_v43 = vld [vmem:[%s3213_s11 + $0x50] sm:$0xff] }
  0x1d   : > { %2595 = vmatprep.subr.mxu0 %v1102_v26  ;;  %2858 = vmatprep.subr.mxu1 %v1102_v26  ;;  %v3341_v36 = vld [vmem:[%s3213_s11 + $0x128] sm:$0xff]  ;;  %v1094_v39 = vld [vmem:[%s4145_s2 + $0x18] sm:$0xff]  ;;  %v285_v44 = vld [vmem:[%s3213_s11 + $0x60] sm:$0xff] }
  0x1e   : > { %2983 = vset.pattern.permute.xlu1 %v3138_v5  ;;  %2986 = vset.pattern.permute.xlu0 %v3136_v0  ;;  %v1092_v41 = vld [vmem:[%s4145_s2 + $0x8] sm:$0xff]  ;;  %v287_v47 = vld [vmem:[%s3213_s11 + $0x70] sm:$0xff]  ;;  %v3393_v48 = vld [vmem:[%s4144_s1] ss:$0 sm:$0xff] }
  0x1f   : > { %779 = vperm.xlu1 %2983, %v273_v2   ;;  %329 = vperm.xlu0 %2986, %v3224_v4   ;;  %v3400_v50 = vld [vmem:[%s4144_s1 + $0x1] ss:$0 sm:$0xff]  ;;  %v3409_v54 = vld [vmem:[%s4144_s1 + $0x2] ss:$0 sm:$0xff]  ;;  %v3419_v59 = vld [vmem:[%s4148_s5] ss:$0 sm:$0xff] }
  0x20   : > { %2596 = vmatpush3.msra.mxu0 %v1102_v26  ;;  %2874 = vmatpush3.msra.mxu1 %v1102_v26  ;;  %v291_v22 = vld [vmem:[%s3213_s11 + $0x90] sm:$0xff] }
  0x21   : > { %2597 = vmatprep.subr.mxu0 %v1101_v28  ;;  %2859 = vmatprep.subr.mxu1 %v1101_v28 }
  0x22   : > { %2598 = vmatpush3.msra.mxu0 %v1101_v28  ;;  %2875 = vmatpush3.msra.mxu1 %v1101_v28 }
  0x23   : > { %2984 = vset.pattern.permute.xlu1 %v3136_v0  ;;  %339 = vperm.xlu0 %2986, %v3230_v6  }
  0x24   : > { %324 = vperm.xlu1 %2984, %v275_v7   ;;  %2599 = vmatprep.subr.mxu0 %v1100_v30 }
  0x25   : > { %2600 = vmatpush3.msra.mxu0 %v1100_v30  ;;  %2860 = vmatprep.subr.mxu1 %v1100_v30 }
  0x26   : > { %2601 = vmatprep.subr.mxu0 %v1099_v32  ;;  %2876 = vmatpush3.msra.mxu1 %v1100_v30 }
  0x27   : > { %349 = vperm.xlu0 %2986, %v3236_v8   ;;  %2602 = vmatpush3.msra.mxu0 %v1099_v32 }
  0x28   : > { %2985 = vset.pattern.permute.xlu1 %v3137_v3  ;;  %2603 = vmatprep.subr.mxu0 %v1098_v34 }
  0x29   : > { %554 = vperm.xlu1 %2985, %v275_v7   ;;  %2604 = vmatpush3.msra.mxu0 %v1098_v34 }
  0x2a   : > { %2605 = vmatprep.subr.mxu0 %v1097_v35  ;;  %2861 = vmatprep.subr.mxu1 %v1099_v32 }
  0x2b   : > { %359 = vperm.xlu0 %2986, %v3241_v9   ;;  %2606 = vmatpush3.msra.mxu0 %v1097_v35 }
  0x2c   : > { %2607 = vmatprep.subr.mxu0 %v1096_v37  ;;  %2877 = vmatpush3.msra.mxu1 %v1099_v32 }
  0x2d   : > { %558 = vperm.xlu1 %2985, %v3224_v4   ;;  %2608 = vmatpush3.msra.mxu0 %v1096_v37 }
  0x2e   : > { %2609 = vmatprep.subr.mxu0 %v1095_v38  ;;  %2862 = vmatprep.subr.mxu1 %v1098_v34 }
  0x2f   : > { %369 = vperm.xlu0 %2986, %v3245_v10   ;;  %2610 = vmatpush3.msra.mxu0 %v1095_v38 }
  0x30   : > { %2611 = vmatprep.subr.mxu0 %v1094_v39  ;;  %2878 = vmatpush3.msra.mxu1 %v1098_v34 }
  0x31   : > { %2987 = vset.pattern.permute.xlu1 %v3138_v5  ;;  %2612 = vmatpush3.msra.mxu0 %v1094_v39 }
  0x32   : > { %787 = vperm.xlu1 %2987, %v275_v7   ;;  %2613 = vmatprep.subr.mxu0 %v1093_v40  ;;  %v289_v7 = vld [vmem:[%s3213_s11 + $0x80] sm:$0xff] }
  0x33   : > { %379 = vperm.xlu0 %2986, %v3250_v11   ;;  %2614 = vmatpush3.msra.mxu0 %v1093_v40 }
  0x34   : > { %2615 = vmatprep.subr.mxu0 %v1092_v41  ;;  %2863 = vmatprep.subr.mxu1 %v1097_v35 }
  0x35   : > { %2616 = vmatpush3.msra.mxu0 %v1092_v41  ;;  %2879 = vmatpush3.msra.mxu1 %v1097_v35  ;;  %v293_v35 = vld [vmem:[%s3213_s11 + $0xa0] sm:$0xff] }
  0x36   : > { %2988 = vset.pattern.permute.xlu1 %v3136_v0  ;;  %2617 = vmatprep.subr.mxu0 %v1091_v42 }
  0x37   : > { %334 = vperm.xlu1 %2988, %v277_v12   ;;  %389 = vperm.xlu0 %2986, %v3256_v13  }
  0x38   : > { %2618 = vmatpush3.msra.mxu0 %v1091_v42  ;;  %2864 = vmatprep.subr.mxu1 %v1096_v37 }
  0x39   : > { %2880 = vmatpush3.msra.mxu1 %v1096_v37 }
  0x3a   : > { %2865 = vmatprep.subr.mxu1 %v1095_v38 }
  0x3b   : > { %2989 = vset.pattern.permute.xlu1 %v3137_v3  ;;  %399 = vperm.xlu0 %2986, %v3261_v14  }
  0x3c   : > { %562 = vperm.xlu1 %2989, %v277_v12   ;;  %2881 = vmatpush3.msra.mxu1 %v1095_v38 }
  0x3d   : > { %2866 = vmatprep.subr.mxu1 %v1094_v39 }
  0x3e   : > { %2882 = vmatpush3.msra.mxu1 %v1094_v39 }
  0x3f   : > { %409 = vperm.xlu0 %2986, %v3266_v15   ;;  %2867 = vmatprep.subr.mxu1 %v1093_v40 }
  0x40   : > { %566 = vperm.xlu1 %2989, %v3230_v6   ;;  %2883 = vmatpush3.msra.mxu1 %v1093_v40 }
  0x41   : > { %2868 = vmatprep.subr.mxu1 %v1092_v41 }
  0x42   : > { %2884 = vmatpush3.msra.mxu1 %v1092_v41 }
  0x43   : > { %419 = vperm.xlu0 %2986, %v3271_v16   ;;  %2869 = vmatprep.subr.mxu1 %v1091_v42 }
  0x44   : > { %2990 = vset.pattern.permute.xlu1 %v3138_v5  ;;  %2885 = vmatpush3.msra.mxu1 %v1091_v42 }
  0x45   : > { %795 = vperm.xlu1 %2990, %v277_v12  }
  0x47   : > { %429 = vperm.xlu0 %2986, %v3276_v17  }
  0x49   : > { %2991 = vset.pattern.permute.xlu1 %v3136_v0 }
  0x4a   : > { %344 = vperm.xlu1 %2991, %v279_v18  }
  0x4b   : > { %439 = vperm.xlu0 %2986, %v3281_v19  }
  0x4e   : > { %2992 = vset.pattern.permute.xlu1 %v3137_v3 }
  0x4f   : > { %570 = vperm.xlu1 %2992, %v279_v18   ;;  %449 = vperm.xlu0 %2986, %v3289_v21  }
  0x53   : > { %574 = vperm.xlu1 %2992, %v3236_v8   ;;  %459 = vperm.xlu0 %2986, %v3300_v24  }
  0x57   : > { %2993 = vset.pattern.permute.xlu1 %v3138_v5  ;;  %469 = vperm.xlu0 %2986, %v3311_v27  }
  0x58   : > { %803 = vperm.xlu1 %2993, %v279_v18  }
  0x5b   : > { %479 = vperm.xlu0 %2986, %v3319_v29  }
  0x5c   : > { %2994 = vset.pattern.permute.xlu1 %v3136_v0 }
  0x5d   : > { %354 = vperm.xlu1 %2994, %v281_v31  }
  0x5f   : > { %489 = vperm.xlu0 %2986, %v3331_v33  }
  0x61   : > { %2995 = vset.pattern.permute.xlu1 %v3137_v3 }
  0x62   : > { %578 = vperm.xlu1 %2995, %v281_v31  }
  0x63   : > { %499 = vperm.xlu0 %2986, %v3341_v36  }
  0x66   : > { %582 = vperm.xlu1 %2995, %v3241_v9  }
  0x67   : > { %3038 = vset.pattern.permute.xlu0 %v3138_v5 }
  0x68   : > { %783 = vperm.xlu0 %3038, %v3216_v1  }
  0x6a   : > { %2996 = vset.pattern.permute.xlu1 %v3138_v5 }
  0x6b   : > { %811 = vperm.xlu1 %2996, %v281_v31  }
  0x6c   : > { %791 = vperm.xlu0 %3038, %v3224_v4  }
  0x6f   : > { %2997 = vset.pattern.permute.xlu1 %v3136_v0 }
  0x70   : > { %364 = vperm.xlu1 %2997, %v283_v43   ;;  %799 = vperm.xlu0 %3038, %v3230_v6  }
  0x74   : > { %2998 = vset.pattern.permute.xlu1 %v3137_v3  ;;  %807 = vperm.xlu0 %3038, %v3236_v8  }
  0x75   : > { %586 = vperm.xlu1 %2998, %v283_v43  }
  0x78   : > { %815 = vperm.xlu0 %3038, %v3241_v9  }
  0x79   : > { %590 = vperm.xlu1 %2998, %v3245_v10  }
  0x7c   : > { %823 = vperm.xlu0 %3038, %v3245_v10  }
  0x7d   : > { %2999 = vset.pattern.permute.xlu1 %v3138_v5 }
  0x7e   : > { %819 = vperm.xlu1 %2999, %v283_v43  }
  0x80   : > { %831 = vperm.xlu0 %3038, %v3250_v11  }
  0x82   : > { %3000 = vset.pattern.permute.xlu1 %v3136_v0 }
  0x83   : > { %374 = vperm.xlu1 %3000, %v285_v44  }
  0x84   : > { %839 = vperm.xlu0 %3038, %v3256_v13  }
  0x87   : > { %3001 = vset.pattern.permute.xlu1 %v3137_v3 }
  0x88   : > { %594 = vperm.xlu1 %3001, %v285_v44   ;;  %847 = vperm.xlu0 %3038, %v3261_v14  }
  0x8c   : > { %598 = vperm.xlu1 %3001, %v3250_v11   ;;  %855 = vperm.xlu0 %3038, %v3266_v15  }
  0x90   : > { %v3385_v45 = vpop.permute.xlu1 %319  ;;  %3002 = vset.pattern.permute.xlu1 %v3138_v5  ;;  %v315_v46 = vpop.permute.xlu0 %314  ;;  %863 = vperm.xlu0 %3038, %v3271_v16  }
  0x91   : > { %827 = vperm.xlu1 %3002, %v285_v44   ;;  %v506_v49 = vmul.f32 %v3393_v48, %v315_v46 }
  0x94   : > { %871 = vperm.xlu0 %3038, %v3276_v17  }
  0x95   : > { %v3402_v51 = vpop.permute.xlu1 %550  ;;  %3003 = vset.pattern.permute.xlu1 %v3136_v0  ;;  %v547_v52 = vpop.permute.xlu0 %546 }
  0x96   : > { %384 = vperm.xlu1 %3003, %v287_v47   ;;  %v701_v53 = vmul.f32 %v3400_v50, %v547_v52  ;;  %v702_v52 = vmul.f32 %v3400_v50, %v3402_v51 }
  0x98   : > { %879 = vperm.xlu0 %3038, %v3281_v19   ;;  %v739_v55 = vadd.f32 %v701_v53, %v506_v49 }
  0x9a   : > { %3004 = vset.pattern.permute.xlu1 %v3137_v3  ;;  %v780_v56 = vpop.permute.xlu1 %779  ;;  %v3413_v57 = vpop.permute.xlu0 %329 }
  0x9b   : > { %v934_v58 = vmul.f32 %v3409_v54, %v780_v56  ;;  %602 = vperm.xlu1 %3004, %v287_v47   ;;  %v507_v56 = vmul.f32 %v3393_v48, %v3385_v45  ;;  %v509_v51 = vmul.f32 %v3393_v48, %v3413_v57 }
  0x9c   : > { %887 = vperm.xlu0 %3038, %v3289_v21  }
  0x9d   : > { %v972_v60 = vadd.f32 %v934_v58, %v739_v55 }
  0x9e   : > { %v3422_v61 = vpop.permute.xlu0 %339 }
  0x9f   : > { %606 = vperm.xlu1 %3004, %v3256_v13   ;;  %v3425_v62 = vpop.permute.xlu1 %324  ;;  %v1015_v63 = vadd.f32 %v3419_v59, %v972_v60 }
  0xa0   : > { %895 = vperm.xlu0 %3038, %v3300_v24   ;;  %v508_v46 = vmul.f32 %v3393_v48, %v3425_v62 }
  0xa1   : > { %v1053_v1 = vmax.f32 %v1015_v63, 0.0 }
  0xa2   : > { %v3429_v2 = vpop.permute.xlu0 %349 }
  0xa3   : > { %3005 = vset.pattern.permute.xlu1 %v3138_v5  ;;  %2619 = vmatprep.mubr.f32.mxu0 %v1053_v1  ;;  %v740_v1 = vadd.f32 %v702_v52, %v507_v56 }
  0xa4   : > { %835 = vperm.xlu1 %3005, %v287_v47   ;;  %v555_v4 = vpop.permute.xlu1 %554  ;;  %903 = vperm.xlu0 %3038, %v3311_v27  }
  0xa5   : > { %v703_v43 = vmul.f32 %v3400_v50, %v555_v4 }
  0xa6   : > { %v3433_v6 = vpop.permute.xlu0 %359 }
  0xa7   : > { %v741_v53 = vadd.f32 %v703_v43, %v508_v46  ;;  %v511_v43 = vmul.f32 %v3393_v48, %v3422_v61 }
  0xa8   : > { %3006 = vset.pattern.permute.xlu1 %v3136_v0  ;;  %v3437_v8 = vpop.permute.xlu1 %558  ;;  %911 = vperm.xlu0 %3038, %v3319_v29  }
  0xa9   : > { %394 = vperm.xlu1 %3006, %v289_v7  }
  0xaa   : > { %v3440_v9 = vpop.permute.xlu0 %369 }
  0xac   : > { %919 = vperm.xlu0 %3038, %v3331_v33  }
  0xad   : > { %3007 = vset.pattern.permute.xlu1 %v3137_v3  ;;  %v788_v10 = vpop.permute.xlu1 %787 }
  0xae   : > { %610 = vperm.xlu1 %3007, %v289_v7   ;;  %v3444_v11 = vpop.permute.xlu0 %379  ;;  %v936_v47 = vmul.f32 %v3409_v54, %v788_v10 }
  0xb0   : > { %927 = vperm.xlu0 %3038, %v3341_v36   ;;  %v974_v60 = vadd.f32 %v936_v47, %v741_v53 }
  0xb2   : > { %614 = vperm.xlu1 %3007, %v3261_v14   ;;  %v335_v12 = vpop.permute.xlu1 %334  ;;  %v3448_v13 = vpop.permute.xlu0 %389 }
  0xb3   : > { %v510_v62 = vmul.f32 %v3393_v48, %v335_v12 }
  0xb6   : > { %3008 = vset.pattern.permute.xlu1 %v3138_v5  ;;  %v3451_v18 = vpop.permute.xlu0 %399 }
  0xb7   : > { %843 = vperm.xlu1 %3008, %v289_v7   ;;  %v563_v20 = vpop.permute.xlu1 %562  ;;  %v704_v7 = vmul.f32 %v3400_v50, %v3437_v8 }
  0xb8   : > { %v705_v55 = vmul.f32 %v3400_v50, %v563_v20 }
  0xb9   : > { %v742_v47 = vadd.f32 %v704_v7, %v509_v51 }
  0xba   : > { %v3454_v23 = vpop.permute.xlu0 %409  ;;  %v743_v10 = vadd.f32 %v705_v55, %v510_v62  ;;  %v513_v55 = vmul.f32 %v3393_v48, %v3429_v2 }
  0xbb   : > { %3009 = vset.pattern.permute.xlu1 %v3136_v0  ;;  %v3457_v25 = vpop.permute.xlu1 %566 }
  0xbc   : > { %404 = vperm.xlu1 %3009, %v291_v22  }
  0xbe   : > { %v3459_v26 = vpop.permute.xlu0 %419 }
  0xc0   : > { %3010 = vset.pattern.permute.xlu1 %v3137_v3  ;;  %v796_v14 = vpop.permute.xlu1 %795 }
  0xc1   : > { %618 = vperm.xlu1 %3010, %v291_v22   ;;  %v938_v63 = vmul.f32 %v3409_v54, %v796_v14  ;;  %v1017_v14 = vadd.f32 %v3419_v59, %v974_v60 }
  0xc2   : > { %v3462_v28 = vpop.permute.xlu0 %429 }
  0xc3   : > { %v1055_v62 = vmax.f32 %v1017_v14, 0.0 }
  0xc5   : > { %622 = vperm.xlu1 %3010, %v3266_v15   ;;  %v345_v30 = vpop.permute.xlu1 %344 }
  0xc6   : > { %v3465_v31 = vpop.permute.xlu0 %439  ;;  %v512_v57 = vmul.f32 %v3393_v48, %v345_v30 }
  0xc9   : > { %3011 = vset.pattern.permute.xlu1 %v3138_v5 }
  0xca   : > { %851 = vperm.xlu1 %3011, %v291_v22   ;;  %v571_v32 = vpop.permute.xlu1 %570  ;;  %v3468_v34 = vpop.permute.xlu0 %449  ;;  %v976_v22 = vadd.f32 %v938_v63, %v743_v10 }
  0xcb   : > { %v707_v20 = vmul.f32 %v3400_v50, %v571_v32  ;;  %v706_v32 = vmul.f32 %v3400_v50, %v3457_v25 }
  0xcd   : > { %v745_v56 = vadd.f32 %v707_v20, %v512_v57  ;;  %v744_v2 = vadd.f32 %v706_v32, %v511_v43  ;;  %v297_v32 = vld [vmem:[%s3213_s11 + $0xc0] sm:$0xff] }
  0xce   : > { %3012 = vset.pattern.permute.xlu1 %v3136_v0  ;;  %v575_v37 = vpop.permute.xlu1 %574  ;;  %v3472_v38 = vpop.permute.xlu0 %459 }
  0xcf   : > { %414 = vperm.xlu1 %3012, %v293_v35   ;;  %v708_v63 = vmul.f32 %v3400_v50, %v575_v37  ;;  %v515_v37 = vmul.f32 %v3393_v48, %v3433_v6 }
  0xd2   : > { %v3474_v39 = vpop.permute.xlu0 %469 }
  0xd3   : > { %3013 = vset.pattern.permute.xlu1 %v3137_v3  ;;  %v804_v15 = vpop.permute.xlu1 %803 }
  0xd4   : > { %626 = vperm.xlu1 %3013, %v293_v35   ;;  %v940_v46 = vmul.f32 %v3409_v54, %v804_v15  ;;  %v1019_v15 = vadd.f32 %v3419_v59, %v976_v22 }
  0xd6   : > { %v3477_v40 = vpop.permute.xlu0 %479 }
  0xd8   : > { %630 = vperm.xlu1 %3013, %v3271_v16   ;;  %v355_v41 = vpop.permute.xlu1 %354  ;;  %v295_v16 = vld [vmem:[%s3213_s11 + $0xb0] sm:$0xff] }
  0xd9   : > { %v514_v25 = vmul.f32 %v3393_v48, %v355_v41  ;;  %v746_v41 = vadd.f32 %v708_v63, %v513_v55 }
  0xda   : > { %v3480_v42 = vpop.permute.xlu0 %489 }
  0xdc   : > { %3014 = vset.pattern.permute.xlu1 %v3138_v5 }
  0xdd   : > { %859 = vperm.xlu1 %3014, %v293_v35   ;;  %v579_v44 = vpop.permute.xlu1 %578 }
  0xde   : > { %v3487_v49 = vpop.permute.xlu0 %499  ;;  %v709_v61 = vmul.f32 %v3400_v50, %v579_v44 }
  0xe1   : > { %3015 = vset.pattern.permute.xlu1 %v3136_v0  ;;  %v583_v58 = vpop.permute.xlu1 %582 }
  0xe2   : > { %424 = vperm.xlu1 %3015, %v295_v16   ;;  %v710_v43 = vmul.f32 %v3400_v50, %v583_v58 }
  0xe3   : > { %v784_v4 = vpop.permute.xlu0 %783 }
  0xe4   : > { %v935_v45 = vmul.f32 %v3409_v54, %v784_v4 }
  0xe6   : > { %v973_v35 = vadd.f32 %v935_v45, %v740_v1  ;;  %3016 = vset.pattern.permute.xlu1 %v3137_v3  ;;  %v812_v12 = vpop.permute.xlu1 %811  ;;  %v978_v1 = vadd.f32 %v940_v46, %v745_v56  ;;  %v747_v45 = vadd.f32 %v709_v61, %v514_v25  ;;  %v748_v61 = vadd.f32 %v710_v43, %v515_v37  ;;  %v299_v43 = vld [vmem:[%s3213_s11 + $0xd0] sm:$0xff] }
  0xe7   : > { %634 = vperm.xlu1 %3016, %v295_v16   ;;  %v792_v8 = vpop.permute.xlu0 %791  ;;  %v942_v4 = vmul.f32 %v3409_v54, %v812_v12  ;;  %v1057_v12 = vmax.f32 %v1019_v15, 0.0 }
  0xe8   : > { %v937_v52 = vmul.f32 %v3409_v54, %v792_v8  ;;  %v1016_v53 = vadd.f32 %v3419_v59, %v973_v35  ;;  %v1021_v14 = vadd.f32 %v3419_v59, %v978_v1 }
  0xe9   : > { %v980_v35 = vadd.f32 %v942_v4, %v747_v45 }
  0xea   : > { %v975_v60 = vadd.f32 %v937_v52, %v742_v47  ;;  %v1054_v30 = vmax.f32 %v1016_v53, 0.0  ;;  %v517_v52 = vmul.f32 %v3393_v48, %v3440_v9  ;;  %v1059_v55 = vmax.f32 %v1021_v14, 0.0 }
  0xeb   : > { %638 = vperm.xlu1 %3016, %v3276_v17   ;;  %v365_v51 = vpop.permute.xlu1 %364  ;;  %v800_v7 = vpop.permute.xlu0 %799  ;;  %v1023_v56 = vadd.f32 %v3419_v59, %v980_v35 }
  0xec   : > { %v939_v10 = vmul.f32 %v3409_v54, %v800_v7  ;;  %2620 = vmatmul.mubr.f32.vlgmr.msra.gmra.mxu0 %v1054_v30  ;;  %v1018_v44 = vadd.f32 %v3419_v59, %v975_v60  ;;  %v516_v4 = vmul.f32 %v3393_v48, %v365_v51 }
  0xed   : > { %2622 = vmatprep.mubr.f32.mxu0 %v1055_v62  ;;  %v1061_v25 = vmax.f32 %v1023_v56, 0.0 }
  0xee   : > { %v977_v20 = vadd.f32 %v939_v10, %v744_v2  ;;  %v1056_v22 = vmax.f32 %v1018_v44, 0.0 }
  0xef   : > { %3017 = vset.pattern.permute.xlu1 %v3138_v5  ;;  %v808_v17 = vpop.permute.xlu0 %807 }
  0xf0   : > { %v941_v57 = vmul.f32 %v3409_v54, %v808_v17  ;;  %867 = vperm.xlu1 %3017, %v295_v16   ;;  %v587_v46 = vpop.permute.xlu1 %586  ;;  %2623 = vmatmul.mubr.f32.gmra.mxu0 %v1056_v22  ;;  %v1020_v6 = vadd.f32 %v3419_v59, %v977_v20 }
  0xf1   : > { %2625 = vmatprep.mubr.f32.mxu0 %v1057_v12  ;;  %v711_v62 = vmul.f32 %v3400_v50, %v587_v46  ;;  %v519_v46 = vmul.f32 %v3393_v48, %v3444_v11 }
  0xf2   : > { %v979_v8 = vadd.f32 %v941_v57, %v746_v41  ;;  %v1058_v47 = vmax.f32 %v1020_v6, 0.0 }
  0xf3   : > { %v816_v53 = vpop.permute.xlu0 %815  ;;  %v749_v44 = vadd.f32 %v711_v62, %v516_v4 }
  0xf4   : > { %v943_v58 = vmul.f32 %v3409_v54, %v816_v53  ;;  %3018 = vset.pattern.permute.xlu1 %v3136_v0  ;;  %v591_v16 = vpop.permute.xlu1 %590  ;;  %2626 = vmatmul.mubr.f32.gmra.mxu0 %v1058_v47  ;;  %v1022_v60 = vadd.f32 %v3419_v59, %v979_v8 }
  0xf5   : > { %v712_v30 = vmul.f32 %v3400_v50, %v591_v16  ;;  %434 = vperm.xlu1 %3018, %v297_v32   ;;  %2628 = vmatprep.mubr.f32.mxu0 %v1059_v55 }
  0xf6   : > { %v981_v9 = vadd.f32 %v943_v58, %v748_v61  ;;  %v1060_v15 = vmax.f32 %v1022_v60, 0.0 }
  0xf7   : > { %v750_v63 = vadd.f32 %v712_v30, %v517_v52  ;;  %v824_v1 = vpop.permute.xlu0 %823 }
  0xf8   : > { %v945_v7 = vmul.f32 %v3409_v54, %v824_v1  ;;  %2629 = vmatmul.mubr.f32.gmra.mxu0 %v1060_v15  ;;  %v1024_v2 = vadd.f32 %v3419_v59, %v981_v9  ;;  %v301_v15 = vld [vmem:[%s3213_s11 + $0xe0] sm:$0xff]  ;;  %v521_v1 = vmul.f32 %v3393_v48, %v3448_v13 }
  0xf9   : > { %3019 = vset.pattern.permute.xlu1 %v3137_v3  ;;  %v820_v10 = vpop.permute.xlu1 %819  ;;  %2631 = vmatprep.mubr.f32.mxu0 %v1061_v25 }
  0xfa   : > { %v983_v45 = vadd.f32 %v945_v7, %v750_v63  ;;  %v944_v37 = vmul.f32 %v3409_v54, %v820_v10  ;;  %642 = vperm.xlu1 %3019, %v297_v32   ;;  %v1062_v20 = vmax.f32 %v1024_v2, 0.0 }
  0xfb   : > { %v832_v57 = vpop.permute.xlu0 %831 }
  0xfc   : > { %v982_v22 = vadd.f32 %v944_v37, %v749_v44  ;;  %2632 = vmatmul.mubr.f32.gmra.mxu0 %v1062_v20  ;;  %v1026_v51 = vadd.f32 %v3419_v59, %v983_v45  ;;  %v947_v8 = vmul.f32 %v3409_v54, %v832_v57  ;;  %v523_v57 = vmul.f32 %v3393_v48, %v3451_v18 }
  0xfe   : > { %646 = vperm.xlu1 %3019, %v3281_v19   ;;  %v375_v41 = vpop.permute.xlu1 %374  ;;  %v1025_v35 = vadd.f32 %v3419_v59, %v982_v22  ;;  %v1064_v12 = vmax.f32 %v1026_v51, 0.0 }
  0xff   : > { %v840_v63 = vpop.permute.xlu0 %839 }
 0x100   : > { %v1063_v17 = vmax.f32 %v1025_v35, 0.0  ;;  %v949_v4 = vmul.f32 %v3409_v54, %v840_v63 }
 0x102   : > { %3020 = vset.pattern.permute.xlu1 %v3138_v5  ;;  %2634 = vmatprep.mubr.f32.mxu0 %v1063_v17 }
 0x103   : > { %875 = vperm.xlu1 %3020, %v297_v32   ;;  %v595_v14 = vpop.permute.xlu1 %594  ;;  %2635 = vmatmul.mubr.f32.gmra.mxu0 %v1064_v12  ;;  %v518_v32 = vmul.f32 %v3393_v48, %v375_v41 }
 0x104   : > { %v713_v47 = vmul.f32 %v3400_v50, %v595_v14  ;;  %v303_v14 = vld [vmem:[%s3213_s11 + $0xf0] sm:$0xff] }
 0x106   : > { %v751_v56 = vadd.f32 %v713_v47, %v518_v32 }
 0x107   : > { %3021 = vset.pattern.permute.xlu1 %v3136_v0  ;;  %v599_v6 = vpop.permute.xlu1 %598 }
 0x108   : > { %v714_v19 = vmul.f32 %v3400_v50, %v599_v6  ;;  %444 = vperm.xlu1 %3021, %v299_v43  }
 0x10a   : > { %v752_v52 = vadd.f32 %v714_v19, %v519_v46 }
 0x10c   : > { %v985_v53 = vadd.f32 %v947_v8, %v752_v52  ;;  %3022 = vset.pattern.permute.xlu1 %v3137_v3  ;;  %v828_v55 = vpop.permute.xlu1 %827 }
 0x10d   : > { %v946_v11 = vmul.f32 %v3409_v54, %v828_v55  ;;  %650 = vperm.xlu1 %3022, %v299_v43  }
 0x10e   : > { %v1028_v58 = vadd.f32 %v3419_v59, %v985_v53 }
 0x10f   : > { %v984_v61 = vadd.f32 %v946_v11, %v751_v56 }
 0x110   : > { %v1066_v62 = vmax.f32 %v1028_v58, 0.0 }
 0x111   : > { %654 = vperm.xlu1 %3022, %v3289_v21   ;;  %v385_v16 = vpop.permute.xlu1 %384  ;;  %v1027_v60 = vadd.f32 %v3419_v59, %v984_v61 }
 0x112   : > { %v520_v10 = vmul.f32 %v3393_v48, %v385_v16 }
 0x113   : > { %v1065_v30 = vmax.f32 %v1027_v60, 0.0 }
 0x115   : > { %3023 = vset.pattern.permute.xlu1 %v3138_v5  ;;  %2637 = vmatprep.mubr.f32.mxu0 %v1065_v30  ;;  %v305_v30 = vld [vmem:[%s3213_s11 + $0x100] sm:$0xff] }
 0x116   : > { %883 = vperm.xlu1 %3023, %v299_v43   ;;  %v603_v9 = vpop.permute.xlu1 %602  ;;  %2638 = vmatmul.mubr.f32.gmra.mxu0 %v1066_v62  ;;  %v848_v43 = vpop.permute.xlu0 %847 }
 0x117   : > { %v715_v7 = vmul.f32 %v3400_v50, %v603_v9  ;;  %v951_v6 = vmul.f32 %v3409_v54, %v848_v43  ;;  %v525_v9 = vmul.f32 %v3393_v48, %v3454_v23 }
 0x119   : > { %v753_v37 = vadd.f32 %v715_v7, %v520_v10 }
 0x11a   : > { %3024 = vset.pattern.permute.xlu1 %v3136_v0  ;;  %v607_v25 = vpop.permute.xlu1 %606  ;;  %v856_v62 = vpop.permute.xlu0 %855 }
 0x11b   : > { %v716_v21 = vmul.f32 %v3400_v50, %v607_v25  ;;  %454 = vperm.xlu1 %3024, %v301_v15   ;;  %v953_v63 = vmul.f32 %v3409_v54, %v856_v62 }
 0x11d   : > { %v754_v2 = vadd.f32 %v716_v21, %v521_v1 }
 0x11f   : > { %v987_v44 = vadd.f32 %v949_v4, %v754_v2  ;;  %3025 = vset.pattern.permute.xlu1 %v3137_v3  ;;  %v836_v45 = vpop.permute.xlu1 %835 }
 0x120   : > { %v948_v13 = vmul.f32 %v3409_v54, %v836_v45  ;;  %658 = vperm.xlu1 %3025, %v301_v15  }
 0x121   : > { %v1030_v22 = vadd.f32 %v3419_v59, %v987_v44 }
 0x122   : > { %v986_v20 = vadd.f32 %v948_v13, %v753_v37 }
 0x123   : > { %v1068_v17 = vmax.f32 %v1030_v22, 0.0 }
 0x124   : > { %662 = vperm.xlu1 %3025, %v3300_v24   ;;  %v395_v51 = vpop.permute.xlu1 %394  ;;  %v1029_v41 = vadd.f32 %v3419_v59, %v986_v20 }
 0x125   : > { %v522_v47 = vmul.f32 %v3393_v48, %v395_v51  ;;  %v307_v51 = vld [vmem:[%s3213_s11 + $0x110] sm:$0xff] }
 0x126   : > { %v1067_v35 = vmax.f32 %v1029_v41, 0.0  ;;  %v864_v41 = vpop.permute.xlu0 %863 }
 0x128   : > { %3026 = vset.pattern.permute.xlu1 %v3138_v5  ;;  %2640 = vmatprep.mubr.f32.mxu0 %v1067_v35  ;;  %v527_v35 = vmul.f32 %v3393_v48, %v3459_v26 }
 0x129   : > { %891 = vperm.xlu1 %3026, %v301_v15   ;;  %v611_v12 = vpop.permute.xlu1 %610  ;;  %2641 = vmatmul.mubr.f32.gmra.mxu0 %v1068_v17 }
 0x12a   : > { %v717_v19 = vmul.f32 %v3400_v50, %v611_v12  ;;  %v955_v12 = vmul.f32 %v3409_v54, %v864_v41 }
 0x12c   : > { %v755_v53 = vadd.f32 %v717_v19, %v522_v47 }
 0x12d   : > { %3027 = vset.pattern.permute.xlu1 %v3136_v0  ;;  %v615_v46 = vpop.permute.xlu1 %614 }
 0x12e   : > { %v718_v24 = vmul.f32 %v3400_v50, %v615_v46  ;;  %464 = vperm.xlu1 %3027, %v303_v14  }
 0x130   : > { %v756_v8 = vadd.f32 %v718_v24, %v523_v57 }
 0x132   : > { %v989_v52 = vadd.f32 %v951_v6, %v756_v8  ;;  %3028 = vset.pattern.permute.xlu1 %v3137_v3  ;;  %v844_v32 = vpop.permute.xlu1 %843 }
 0x133   : > { %v950_v18 = vmul.f32 %v3409_v54, %v844_v32  ;;  %666 = vperm.xlu1 %3028, %v303_v14   ;;  %v1420_v32 = vld [vmem:[%s4146_s3 + $0x78] sm:$0xff] }
 0x134   : > { %v1032_v56 = vadd.f32 %v3419_v59, %v989_v52  ;;  %2676 = vmatprep.subr.mxu1 %v1420_v32 }
 0x135   : > { %v988_v55 = vadd.f32 %v950_v18, %v755_v53 }
 0x136   : > { %v1070_v16 = vmax.f32 %v1032_v56, 0.0 }
 0x137   : > { %670 = vperm.xlu1 %3028, %v3311_v27   ;;  %v405_v11 = vpop.permute.xlu1 %404  ;;  %v1031_v61 = vadd.f32 %v3419_v59, %v988_v55  ;;  %v1419_v55 = vld [vmem:[%s4146_s3 + $0x70] sm:$0xff] }
 0x138   : > { %v524_v21 = vmul.f32 %v3393_v48, %v405_v11  ;;  %v309_v11 = vld [vmem:[%s3213_s11 + $0x120] sm:$0xff]  ;;  %s251_s11 = sand.u32 1, %s3094_s21  }
 0x139   : > { %v1069_v58 = vmax.f32 %v1031_v61, 0.0  ;;  %v872_v61 = vpop.permute.xlu0 %871  ;;  %s2886_s12 = smul.u32 304, %s251_s11 }
 0x13a   : > { %v957_v62 = vmul.f32 %v3409_v54, %v872_v61 }
 0x13b   : > { %3029 = vset.pattern.permute.xlu1 %v3138_v5  ;;  %2643 = vmatprep.mubr.f32.mxu0 %v1069_v58  ;;  %v1417_v58 = vld [vmem:[%s4146_s3 + $0x60] sm:$0xff]  ;;  %s3879_s21 = scalar_lea.vmem [#allocation2], %s2886_s12  }
 0x13c   : > { %899 = vperm.xlu1 %3029, %v303_v14   ;;  %v619_v60 = vpop.permute.xlu1 %618  ;;  %2644 = vmatmul.mubr.f32.gmra.mxu0 %v1070_v16 }
 0x13d   : > { %v719_v1 = vmul.f32 %v3400_v50, %v619_v60  ;;  %v529_v60 = vmul.f32 %v3393_v48, %v3462_v28 }
 0x13f   : > { %v757_v2 = vadd.f32 %v719_v1, %v524_v21 }
 0x140   : > { %3030 = vset.pattern.permute.xlu1 %v3136_v0  ;;  %v623_v15 = vpop.permute.xlu1 %622 }
 0x141   : > { %v720_v27 = vmul.f32 %v3400_v50, %v623_v15  ;;  %474 = vperm.xlu1 %3030, %v305_v30  }
 0x143   : > { %v758_v25 = vadd.f32 %v720_v27, %v525_v9  ;;  %v1416_v9 = vld [vmem:[%s4146_s3 + $0x58] sm:$0xff] }
 0x145   : > { %v991_v4 = vadd.f32 %v953_v63, %v758_v25  ;;  %3031 = vset.pattern.permute.xlu1 %v3137_v3  ;;  %v852_v7 = vpop.permute.xlu1 %851  ;;  %v1414_v25 = vld [vmem:[%s4146_s3 + $0x48] sm:$0xff] }
 0x146   : > { %v952_v23 = vmul.f32 %v3409_v54, %v852_v7  ;;  %674 = vperm.xlu1 %3031, %v305_v30   ;;  %v1413_v7 = vld [vmem:[%s4146_s3 + $0x40] sm:$0xff] }
 0x147   : > { %v1034_v44 = vadd.f32 %v3419_v59, %v991_v4 }
 0x148   : > { %v990_v10 = vadd.f32 %v952_v23, %v757_v2  ;;  %v1412_v23 = vld [vmem:[%s4146_s3 + $0x38] sm:$0xff] }
 0x149   : > { %v1072_v20 = vmax.f32 %v1034_v44, 0.0 }
 0x14a   : > { %678 = vperm.xlu1 %3031, %v3319_v29   ;;  %v415_v45 = vpop.permute.xlu1 %414  ;;  %v1033_v37 = vadd.f32 %v3419_v59, %v990_v10 }
 0x14b   : > { %v526_v57 = vmul.f32 %v3393_v48, %v415_v45 }
 0x14c   : > { %v1071_v13 = vmax.f32 %v1033_v37, 0.0 }
 0x14e   : > { %3032 = vset.pattern.permute.xlu1 %v3138_v5  ;;  %2646 = vmatprep.mubr.f32.mxu0 %v1071_v13  ;;  %v1411_v13 = vld [vmem:[%s4146_s3 + $0x30] sm:$0xff] }
 0x14f   : > { %907 = vperm.xlu1 %3032, %v305_v30   ;;  %v627_v22 = vpop.permute.xlu1 %626  ;;  %2647 = vmatmul.mubr.f32.gmra.mxu0 %v1072_v20 }
 0x150   : > { %v721_v14 = vmul.f32 %v3400_v50, %v627_v22  ;;  %v880_v22 = vpop.permute.xlu0 %879 }
 0x152   : > { %v759_v6 = vadd.f32 %v721_v14, %v526_v57  ;;  %v1407_v14 = vld [vmem:[%s4146_s3 + $0x10] sm:$0xff] }
 0x153   : > { %3033 = vset.pattern.permute.xlu1 %v3136_v0  ;;  %v631_v17 = vpop.permute.xlu1 %630 }
 0x154   : > { %v722_v29 = vmul.f32 %v3400_v50, %v631_v17  ;;  %484 = vperm.xlu1 %3033, %v307_v51  }
 0x156   : > { %v760_v43 = vadd.f32 %v722_v29, %v527_v35  ;;  %v531_v35 = vmul.f32 %v3393_v48, %v3465_v31  ;;  %v959_v29 = vmul.f32 %v3409_v54, %v880_v22  ;;  %v1406_v31 = vld [vmem:[%s4146_s3 + $0x8] sm:$0xff] }
 0x158   : > { %v993_v46 = vadd.f32 %v955_v12, %v760_v43  ;;  %3034 = vset.pattern.permute.xlu1 %v3137_v3  ;;  %v860_v24 = vpop.permute.xlu1 %859 }
 0x159   : > { %v954_v26 = vmul.f32 %v3409_v54, %v860_v24  ;;  %682 = vperm.xlu1 %3034, %v307_v51  }
 0x15a   : > { %v1036_v8 = vadd.f32 %v3419_v59, %v993_v46 }
 0x15b   : > { %v992_v19 = vadd.f32 %v954_v26, %v759_v6 }
 0x15c   : > { %v1074_v18 = vmax.f32 %v1036_v8, 0.0 }
 0x15d   : > { %686 = vperm.xlu1 %3034, %v3331_v33   ;;  %v425_v47 = vpop.permute.xlu1 %424  ;;  %v1035_v52 = vadd.f32 %v3419_v59, %v992_v19  ;;  %v1418_v33 = vld [vmem:[%s4146_s3 + $0x68] sm:$0xff]  ;;  %v1405_v19 = vld [vmem:[%s4146_s3] sm:$0xff] }
 0x15e   : > { %v528_v28 = vmul.f32 %v3393_v48, %v425_v47 }
 0x15f   : > { %v1073_v53 = vmax.f32 %v1035_v52, 0.0 }
 0x161   : > { %3035 = vset.pattern.permute.xlu1 %v3138_v5  ;;  %2649 = vmatprep.mubr.f32.mxu1 %v1073_v53 }
 0x162   : > { %915 = vperm.xlu1 %3035, %v307_v51   ;;  %v635_v56 = vpop.permute.xlu1 %634  ;;  %2650 = vmatmul.mubr.f32.vlgmr.msra.gmra.mxu1 %v1074_v18  ;;  %v1409_v51 = vld [vmem:[%s4146_s3 + $0x20] sm:$0xff] }
 0x163   : > { %2677 = vmatpush3.msra.mxu1 %v1420_v32  ;;  %v723_v15 = vmul.f32 %v3400_v50, %v635_v56  ;;  %v888_v56 = vpop.permute.xlu0 %887 }
 0x164   : > { %2678 = vmatprep.subr.mxu1 %v1419_v55 }
 0x165   : > { %2679 = vmatpush3.msra.mxu1 %v1419_v55  ;;  %v761_v21 = vadd.f32 %v723_v15, %v528_v28 }
 0x166   : > { %3036 = vset.pattern.permute.xlu1 %v3136_v0  ;;  %v639_v16 = vpop.permute.xlu1 %638  ;;  %2680 = vmatprep.subr.mxu1 %v1418_v33  ;;  %v1415_v0 = vld [vmem:[%s4146_s3 + $0x50] sm:$0xff] }
 0x167   : > { %v724_v30 = vmul.f32 %v3400_v50, %v639_v16  ;;  %494 = vperm.xlu1 %3036, %v309_v11   ;;  %2681 = vmatpush3.msra.mxu1 %v1418_v33 }
 0x168   : > { %2682 = vmatprep.subr.mxu1 %v1417_v58 }
 0x169   : > { %v762_v27 = vadd.f32 %v724_v30, %v529_v60  ;;  %2683 = vmatpush3.msra.mxu1 %v1417_v58  ;;  %v961_v58 = vmul.f32 %v3409_v54, %v888_v56 }
 0x16a   : > { %2684 = vmatprep.subr.mxu1 %v1416_v9 }
 0x16b   : > { %v995_v63 = vadd.f32 %v957_v62, %v762_v27  ;;  %3037 = vset.pattern.permute.xlu1 %v3137_v3  ;;  %v868_v1 = vpop.permute.xlu1 %867  ;;  %2685 = vmatpush3.msra.mxu1 %v1416_v9 }
 0x16c   : > { %v956_v4 = vmul.f32 %v3409_v54, %v868_v1  ;;  %690 = vperm.xlu1 %3037, %v309_v11   ;;  %2686 = vmatprep.subr.mxu1 %v1415_v0 }
 0x16d   : > { %2687 = vmatpush3.msra.mxu1 %v1415_v0  ;;  %v1038_v3 = vadd.f32 %v3419_v59, %v995_v63 }
 0x16e   : > { %v994_v2 = vadd.f32 %v956_v4, %v761_v21  ;;  %2688 = vmatprep.subr.mxu1 %v1414_v25  ;;  %v896_v4 = vpop.permute.xlu0 %895 }
 0x16f   : > { %2689 = vmatpush3.msra.mxu1 %v1414_v25  ;;  %v1076_v37 = vmax.f32 %v1038_v3, 0.0  ;;  %v963_v3 = vmul.f32 %v3409_v54, %v896_v4 }
 0x170   : > { %694 = vperm.xlu1 %3037, %v3341_v36   ;;  %v435_v10 = vpop.permute.xlu1 %434  ;;  %v1037_v44 = vadd.f32 %v3419_v59, %v994_v2  ;;  %2690 = vmatprep.subr.mxu1 %v1413_v7  ;;  %v1410_v36 = vld [vmem:[%s4146_s3 + $0x28] sm:$0xff]  ;;  %v535_v2 = vmul.f32 %v3393_v48, %v3472_v38 }
 0x171   : > { %2691 = vmatpush3.msra.mxu1 %v1413_v7  ;;  %v530_v57 = vmul.f32 %v3393_v48, %v435_v10 }
 0x172   : > { %v1075_v45 = vmax.f32 %v1037_v44, 0.0  ;;  %2692 = vmatprep.subr.mxu1 %v1412_v23 }
 0x173   : > { %2693 = vmatpush3.msra.mxu1 %v1412_v23 }
 0x174   : > { %3039 = vset.pattern.permute.xlu1 %v3138_v5  ;;  %2652 = vmatprep.mubr.f32.mxu1 %v1075_v45  ;;  %v1408_v5 = vld [vmem:[%s4146_s3 + $0x18] sm:$0xff] }
 0x175   : > { %923 = vperm.xlu1 %3039, %v309_v11   ;;  %v643_v20 = vpop.permute.xlu1 %642  ;;  %2653 = vmatmul.mubr.f32.gmra.mxu1 %v1076_v37  ;;  %v533_v11 = vmul.f32 %v3393_v48, %v3468_v34 }
 0x176   : > { %2694 = vmatprep.subr.mxu1 %v1411_v13  ;;  %v725_v12 = vmul.f32 %v3400_v50, %v643_v20 }
 0x177   : > { %2695 = vmatpush3.msra.mxu1 %v1411_v13 }
 0x178   : > { %2696 = vmatprep.subr.mxu1 %v1410_v36  ;;  %v763_v6 = vadd.f32 %v725_v12, %v530_v57  ;;  %v537_v12 = vmul.f32 %v3393_v48, %v3474_v39 }
 0x179   : > { %v647_v41 = vpop.permute.xlu1 %646  ;;  %2697 = vmatpush3.msra.mxu1 %v1410_v36 }
 0x17a   : > { %v726_v17 = vmul.f32 %v3400_v50, %v647_v41  ;;  %2698 = vmatprep.subr.mxu1 %v1409_v51 }
 0x17b   : > { %2699 = vmatpush3.msra.mxu1 %v1409_v51 }
 0x17c   : > { %v764_v43 = vadd.f32 %v726_v17, %v531_v35  ;;  %2700 = vmatprep.subr.mxu1 %v1408_v5 }
 0x17d   : > { %2701 = vmatpush3.msra.mxu1 %v1408_v5 }
 0x17e   : > { %v997_v46 = vadd.f32 %v959_v29, %v764_v43  ;;  %v876_v24 = vpop.permute.xlu1 %875  ;;  %2702 = vmatprep.subr.mxu1 %v1407_v14  ;;  %v904_v43 = vpop.permute.xlu0 %903 }
 0x17f   : > { %v958_v26 = vmul.f32 %v3409_v54, %v876_v24  ;;  %2703 = vmatpush3.msra.mxu1 %v1407_v14 }
 0x180   : > { %2704 = vmatprep.subr.mxu1 %v1406_v31  ;;  %v1040_v47 = vadd.f32 %v3419_v59, %v997_v46 }
 0x181   : > { %v996_v8 = vadd.f32 %v958_v26, %v763_v6  ;;  %2705 = vmatpush3.msra.mxu1 %v1406_v31  ;;  %v965_v31 = vmul.f32 %v3409_v54, %v904_v43 }
 0x182   : > { %2706 = vmatprep.subr.mxu1 %v1405_v19  ;;  %v1078_v18 = vmax.f32 %v1040_v47, 0.0 }
 0x183   : > { %v445_v52 = vpop.permute.xlu1 %444  ;;  %v1039_v32 = vadd.f32 %v3419_v59, %v996_v8  ;;  %2707 = vmatpush3.msra.mxu1 %v1405_v19 }
 0x184   : > { %v532_v30 = vmul.f32 %v3393_v48, %v445_v52 }
 0x185   : > { %v1077_v53 = vmax.f32 %v1039_v32, 0.0 }
 0x187   : > { %2655 = vmatprep.mubr.f32.mxu1 %v1077_v53 }
 0x188   : > { %v651_v55 = vpop.permute.xlu1 %650  ;;  %2656 = vmatmul.mubr.f32.gmra.mxu1 %v1078_v18 }
 0x189   : > { %v727_v16 = vmul.f32 %v3400_v50, %v651_v55 }
 0x18b   : > { %v765_v15 = vadd.f32 %v727_v16, %v532_v30  ;;  %v3040_v30 = vld [vmem:[%s4144_s1] ss:$0 sm:$0xff] }
 0x18c   : > { %v655_v33 = vpop.permute.xlu1 %654 }
 0x18d   : > { %v728_v61 = vmul.f32 %v3400_v50, %v655_v33  ;;  %v539_v33 = vmul.f32 %v3393_v48, %v3477_v40 }
 0x18f   : > { %v766_v60 = vadd.f32 %v728_v61, %v533_v11  ;;  %v912_v61 = vpop.permute.xlu0 %911 }
 0x190   : > { %v967_v16 = vmul.f32 %v3409_v54, %v912_v61 }
 0x191   : > { %v999_v62 = vadd.f32 %v961_v58, %v766_v60  ;;  %v884_v9 = vpop.permute.xlu1 %883 }
 0x192   : > { %v960_v27 = vmul.f32 %v3409_v54, %v884_v9 }
 0x193   : > { %v1042_v28 = vadd.f32 %v3419_v59, %v999_v62 }
 0x194   : > { %v998_v0 = vadd.f32 %v960_v27, %v765_v15 }
 0x195   : > { %v1080_v25 = vmax.f32 %v1042_v28, 0.0 }
 0x196   : > { %v455_v63 = vpop.permute.xlu1 %454  ;;  %v1041_v34 = vadd.f32 %v3419_v59, %v998_v0 }
 0x197   : > { %v534_v45 = vmul.f32 %v3393_v48, %v455_v63 }
 0x198   : > { %v1079_v1 = vmax.f32 %v1041_v34, 0.0 }
 0x19a   : > { %2658 = vmatprep.mubr.f32.mxu1 %v1079_v1 }
 0x19b   : > { %v659_v21 = vpop.permute.xlu1 %658  ;;  %2659 = vmatmul.mubr.f32.gmra.mxu1 %v1080_v25 }
 0x19c   : > { %v729_v10 = vmul.f32 %v3400_v50, %v659_v21 }
 0x19e   : > { %v767_v20 = vadd.f32 %v729_v10, %v534_v45 }
 0x19f   : > { %v663_v7 = vpop.permute.xlu1 %662 }
 0x1a0   : > { %v730_v23 = vmul.f32 %v3400_v50, %v663_v7  ;;  %v541_v7 = vmul.f32 %v3040_v30, %v3480_v42  ;;  %v3043_v42 = vld [vmem:[%s4148_s5] ss:$0 sm:$0xff] }
 0x1a2   : > { %v768_v44 = vadd.f32 %v730_v23, %v535_v2  ;;  %v3042_v2 = vld [vmem:[%s4144_s1 + $0x1] ss:$0 sm:$0xff]  ;;  %v920_v23 = vpop.permute.xlu0 %919 }
 0x1a4   : > { %v1001_v37 = vadd.f32 %v963_v3, %v768_v44  ;;  %v892_v13 = vpop.permute.xlu1 %891 }
 0x1a5   : > { %v962_v36 = vmul.f32 %v3409_v54, %v892_v13 }
 0x1a6   : > { %v1044_v51 = vadd.f32 %v3419_v59, %v1001_v37 }
 0x1a7   : > { %v1000_v22 = vadd.f32 %v962_v36, %v767_v20 }
 0x1a8   : > { %v1082_v35 = vmax.f32 %v1044_v51, 0.0 }
 0x1a9   : > { %v465_v41 = vpop.permute.xlu1 %464  ;;  %v1043_v38 = vadd.f32 %v3419_v59, %v1000_v22 }
 0x1aa   : > { %v536_v24 = vmul.f32 %v3393_v48, %v465_v41  ;;  %v3041_v48 = vld [vmem:[%s4144_s1 + $0x2] ss:$0 sm:$0xff] }
 0x1ab   : > { %v1081_v5 = vmax.f32 %v1043_v38, 0.0  ;;  %v969_v44 = vmul.f32 %v3041_v48, %v920_v23 }
 0x1ac   : > { %v2621_v1 = vpop.f32.mrf.mxu0 }
 0x1ad   : > { %2661 = vmatprep.mubr.f32.mxu1 %v1081_v5 }
 0x1ae   : > { %v667_v17 = vpop.permute.xlu1 %666  ;;  %2662 = vmatmul.mubr.f32.gmra.mxu1 %v1082_v35  ;;  %v1178_v21 = vpop.f32.mrf.mxu0 }
 0x1af   : > { %v731_v57 = vmul.f32 %v3400_v50, %v667_v17 }
 0x1b1   : > { %v769_v19 = vadd.f32 %v731_v57, %v536_v24  ;;  %v928_v57 = vpop.permute.xlu0 %927 }
 0x1b2   : > { %v671_v29 = vpop.permute.xlu1 %670 }
 0x1b3   : > { %v732_v14 = vmul.f32 %v3400_v50, %v671_v29 }
 0x1b5   : > { %v770_v46 = vadd.f32 %v732_v14, %v537_v12 }
 0x1b7   : > { %v1003_v6 = vadd.f32 %v965_v31, %v770_v46  ;;  %v900_v26 = vpop.permute.xlu1 %899  ;;  %v543_v46 = vmul.f32 %v3040_v30, %v3487_v49 }
 0x1b8   : > { %v964_v8 = vmul.f32 %v3409_v54, %v900_v26 }
 0x1b9   : > { %v1046_v52 = vadd.f32 %v3419_v59, %v1003_v6 }
 0x1ba   : > { %v1002_v47 = vadd.f32 %v964_v8, %v769_v19  ;;  %v971_v19 = vmul.f32 %v3041_v48, %v928_v57 }
 0x1bb   : > { %v1084_v18 = vmax.f32 %v1046_v52, 0.0 }
 0x1bc   : > { %v475_v32 = vpop.permute.xlu1 %474  ;;  %v1045_v39 = vadd.f32 %v3419_v59, %v1002_v47 }
 0x1bd   : > { %v538_v62 = vmul.f32 %v3040_v30, %v475_v32 }
 0x1be   : > { %v1083_v53 = vmax.f32 %v1045_v39, 0.0 }
 0x1c0   : > { %2664 = vmatprep.mubr.f32.mxu1 %v1083_v53 }
 0x1c1   : > { %v675_v55 = vpop.permute.xlu1 %674  ;;  %2665 = vmatmul.mubr.f32.gmra.mxu1 %v1084_v18 }
 0x1c2   : > { %v733_v58 = vmul.f32 %v3400_v50, %v675_v55 }
 0x1c4   : > { %v771_v27 = vadd.f32 %v733_v58, %v538_v62 }
 0x1c5   : > { %v679_v56 = vpop.permute.xlu1 %678 }
 0x1c6   : > { %v734_v11 = vmul.f32 %v3400_v50, %v679_v56  ;;  %v3741_v56 = vld [vmem:[%s4148_s5 + $0x1] ss:$0 sm:$0xff] }
 0x1c7   : > { %v1179_v49 = vadd.f32 %v3741_v56, %v1178_v21 }
 0x1c8   : > { %v772_v60 = vadd.f32 %v734_v11, %v539_v33 }
 0x1c9   : > { %v1367_v62 = vmax.f32 %v1179_v49, 0.0  ;;  %v1731_v49 = vld [vmem:[%s4147_s4 + $0x60] sm:$0xff] }
 0x1ca   : > { %v1005_v9 = vadd.f32 %v967_v16, %v772_v60  ;;  %v908_v15 = vpop.permute.xlu1 %907  ;;  %v1184_v16 = vadd.f32 %v2621_v1, %v3741_v56 }
 0x1cb   : > { %v966_v40 = vmul.f32 %v3041_v48, %v908_v15 }
 0x1cc   : > { %v1048_v28 = vadd.f32 %v3419_v59, %v1005_v9 }
 0x1cd   : > { %v1004_v0 = vadd.f32 %v966_v40, %v771_v27  ;;  %v1368_v27 = vmax.f32 %v1184_v16, 0.0  ;;  %v1728_v16 = vld [vmem:[%s4147_s4 + $0x48] sm:$0xff] }
 0x1ce   : > { %v1086_v34 = vmax.f32 %v1048_v28, 0.0 }
 0x1cf   : > { %v485_v50 = vpop.permute.xlu1 %484  ;;  %v1047_v54 = vadd.f32 %v3419_v59, %v1004_v0  ;;  %v2624_v59 = vpop.f32.mrf.mxu0 }
 0x1d0   : > { %v540_v37 = vmul.f32 %v3040_v30, %v485_v50 }
 0x1d1   : > { %v1085_v63 = vmax.f32 %v1047_v54, 0.0  ;;  %v1188_v51 = vpop.f32.mrf.mxu0 }
 0x1d2   : > { %v1189_v9 = vadd.f32 %v3741_v56, %v1188_v51 }
 0x1d3   : > { %2667 = vmatprep.mubr.f32.mxu1 %v1085_v63  ;;  %v2627_v17 = vpop.f32.mrf.mxu0 }
 0x1d4   : > { %v683_v25 = vpop.permute.xlu1 %682  ;;  %2668 = vmatmul.mubr.f32.gmra.mxu1 %v1086_v34  ;;  %v1369_v40 = vmax.f32 %v1189_v9, 0.0  ;;  %v1204_v54 = vadd.f32 %v2627_v17, %v3741_v56  ;;  %v1725_v9 = vld [vmem:[%s4147_s4 + $0x30] sm:$0xff] }
 0x1d5   : > { %v735_v10 = vmul.f32 %v3042_v2, %v683_v25  ;;  %v1198_v43 = vpop.f32.mrf.mxu0 }
 0x1d6   : > { %v1199_v0 = vadd.f32 %v3741_v56, %v1198_v43  ;;  %v1372_v25 = vmax.f32 %v1204_v54, 0.0  ;;  %v1722_v54 = vld [vmem:[%s4147_s4 + $0x18] sm:$0xff] }
 0x1d7   : > { %v773_v36 = vadd.f32 %v735_v10, %v540_v37  ;;  %v2630_v24 = vpop.f32.mrf.mxu0 }
 0x1d8   : > { %v687_v4 = vpop.permute.xlu1 %686  ;;  %v1371_v34 = vmax.f32 %v1199_v0, 0.0  ;;  %v1214_v21 = vadd.f32 %v2630_v24, %v3741_v56 }
 0x1d9   : > { %v736_v3 = vmul.f32 %v3042_v2, %v687_v4  ;;  %v1208_v52 = vpop.f32.mrf.mxu0 }
 0x1da   : > { %v1209_v1 = vadd.f32 %v3741_v56, %v1208_v52  ;;  %v1374_v23 = vmax.f32 %v1214_v21, 0.0 }
 0x1db   : > { %v774_v45 = vadd.f32 %v736_v3, %v541_v7  ;;  %v2633_v33 = vpop.f32.mrf.mxu0 }
 0x1dc   : > { %v1373_v7 = vmax.f32 %v1209_v1, 0.0  ;;  %v1224_v10 = vadd.f32 %v2633_v33, %v3741_v56  ;;  %v1719_v1 = vld [vmem:[%s4147_s4] sm:$0xff] }
 0x1dd   : > { %v1007_v13 = vadd.f32 %v969_v44, %v774_v45  ;;  %v916_v20 = vpop.permute.xlu1 %915  ;;  %v1218_v60 = vpop.f32.mrf.mxu0 }
 0x1de   : > { %v968_v22 = vmul.f32 %v3041_v48, %v916_v20  ;;  %v1376_v37 = vmax.f32 %v1224_v10, 0.0 }
 0x1df   : > { %v1050_v38 = vadd.f32 %v3043_v42, %v1007_v13  ;;  %v2636_v15 = vpop.f32.mrf.mxu0 }
 0x1e0   : > { %v1006_v41 = vadd.f32 %v968_v22, %v773_v36  ;;  %v1234_v13 = vadd.f32 %v2636_v15, %v3741_v56 }
 0x1e1   : > { %v1088_v12 = vmax.f32 %v1050_v38, 0.0  ;;  %v1228_v28 = vpop.f32.mrf.mxu0 }
 0x1e2   : > { %v495_v5 = vpop.permute.xlu1 %494  ;;  %v1049_v35 = vadd.f32 %v3043_v42, %v1006_v41  ;;  %v1229_v45 = vadd.f32 %v3741_v56, %v1228_v28  ;;  %v1378_v51 = vmax.f32 %v1234_v13, 0.0 }
 0x1e3   : > { %v542_v47 = vmul.f32 %v3040_v30, %v495_v5  ;;  %v2639_v63 = vpop.f32.mrf.mxu0 }
 0x1e4   : > { %v1087_v29 = vmax.f32 %v1049_v35, 0.0  ;;  %v1377_v36 = vmax.f32 %v1229_v45, 0.0  ;;  %v1244_v41 = vadd.f32 %v2639_v63, %v3741_v56  ;;  %v1721_v63 = vld [vmem:[%s4147_s4 + $0x10] sm:$0xff] }
 0x1e5   : > { %v1238_v4 = vpop.f32.mrf.mxu0 }
 0x1e6   : > { %2670 = vmatprep.mubr.f32.mxu1 %v1087_v29  ;;  %v1239_v22 = vadd.f32 %v3741_v56, %v1238_v4  ;;  %v1380_v17 = vmax.f32 %v1244_v41, 0.0 }
 0x1e7   : > { %v691_v14 = vpop.permute.xlu1 %690  ;;  %2671 = vmatmul.mubr.f32.gmra.mxu1 %v1088_v12 }
 0x1e8   : > { %v737_v26 = vmul.f32 %v3042_v2, %v691_v14  ;;  %v1379_v38 = vmax.f32 %v1239_v22, 0.0 }
 0x1e9   : > { %v2642_v3 = vpop.f32.mrf.mxu0 }
 0x1ea   : > { %v775_v53 = vadd.f32 %v737_v26, %v542_v47  ;;  %v1254_v29 = vadd.f32 %v2642_v3, %v3741_v56 }
 0x1eb   : > { %v695_v31 = vpop.permute.xlu1 %694 }
 0x1ec   : > { %v738_v6 = vmul.f32 %v3042_v2, %v695_v31  ;;  %v1219_v2 = vadd.f32 %v3741_v56, %v1218_v60  ;;  %v1382_v57 = vmax.f32 %v1254_v29, 0.0  ;;  %v1727_v60 = vld [vmem:[%s4147_s4 + $0x40] sm:$0xff] }
 0x1ee   : > { %v776_v8 = vadd.f32 %v738_v6, %v543_v46  ;;  %v1375_v44 = vmax.f32 %v1219_v2, 0.0 }
 0x1f0   : > { %v1009_v32 = vadd.f32 %v971_v19, %v776_v8  ;;  %v924_v39 = vpop.permute.xlu1 %923  ;;  %v1734_v19 = vld [vmem:[%s4147_s4 + $0x78] sm:$0xff] }
 0x1f1   : > { %v970_v18 = vmul.f32 %v3041_v48, %v924_v39  ;;  %v1194_v48 = vadd.f32 %v2624_v59, %v3741_v56  ;;  %v1248_v59 = vpop.f32.mrf.mxu0  ;;  %2765 = vmatprep.subr.mxu0 %v1734_v19 }
 0x1f2   : > { %v1052_v11 = vadd.f32 %v3043_v42, %v1009_v32  ;;  %v1249_v5 = vadd.f32 %v3741_v56, %v1248_v59  ;;  %2766 = vmatpush3.msra.mxu0 %v1734_v19 }
 0x1f3   : > { %v1008_v55 = vadd.f32 %v970_v18, %v775_v53  ;;  %v1370_v50 = vmax.f32 %v1194_v48, 0.0 }
 0x1f4   : > { %v1090_v30 = vmax.f32 %v1052_v11, 0.0  ;;  %v1381_v12 = vmax.f32 %v1249_v5, 0.0  ;;  %v1732_v11 = vld [vmem:[%s4147_s4 + $0x68] sm:$0xff] }
 0x1f5   : > { %v1051_v61 = vadd.f32 %v3043_v42, %v1008_v55  ;;  %v1733_v55 = vld [vmem:[%s4147_s4 + $0x70] sm:$0xff] }
 0x1f6   : > { %2767 = vmatprep.subr.mxu0 %v1733_v55 }
 0x1f7   : > { %v1089_v58 = vmax.f32 %v1051_v61, 0.0  ;;  %2768 = vmatpush3.msra.mxu0 %v1733_v55  ;;  %v1730_v61 = vld [vmem:[%s4147_s4 + $0x58] sm:$0xff] }
 0x1f8   : > { %2769 = vmatprep.subr.mxu0 %v1732_v11 }
 0x1f9   : > { %2673 = vmatprep.mubr.f32.mxu1 %v1089_v58  ;;  %2770 = vmatpush3.msra.mxu0 %v1732_v11  ;;  %v1729_v58 = vld [vmem:[%s4147_s4 + $0x50] sm:$0xff] }
 0x1fa   : > { %2674 = vmatmul.mubr.f32.gmra.mxu1 %v1090_v30  ;;  %2771 = vmatprep.subr.mxu0 %v1731_v49  ;;  %v1726_v30 = vld [vmem:[%s4147_s4 + $0x38] sm:$0xff] }
 0x1fb   : > { %2708 = vmatprep.mubr.f32.mxu1 %v1367_v62  ;;  %2772 = vmatpush3.msra.mxu0 %v1731_v49 }
 0x1fc   : > { %v2645_v20 = vpop.f32.mrf.mxu0  ;;  %2773 = vmatprep.subr.mxu0 %v1730_v61 }
 0x1fd   : > { %v1264_v31 = vadd.f32 %v2645_v20, %v3741_v56  ;;  %2774 = vmatpush3.msra.mxu0 %v1730_v61 }
 0x1fe   : > { %2709 = vmatmul.mubr.f32.vlgmr.msra.gmra.mxu1 %v1368_v27  ;;  %v1258_v42 = vpop.f32.mrf.mxu0  ;;  %2775 = vmatprep.subr.mxu0 %v1729_v58 }
 0x1ff   : > { %2711 = vmatprep.mubr.f32.mxu1 %v1369_v40  ;;  %v1259_v14 = vadd.f32 %v3741_v56, %v1258_v42  ;;  %v1384_v6 = vmax.f32 %v1264_v31, 0.0  ;;  %2776 = vmatpush3.msra.mxu0 %v1729_v58  ;;  %v1724_v40 = vld [vmem:[%s4147_s4 + $0x28] sm:$0xff] }
 0x200   : > { %2777 = vmatprep.subr.mxu0 %v1728_v16 }
 0x201   : > { %v1383_v46 = vmax.f32 %v1259_v14, 0.0  ;;  %2778 = vmatpush3.msra.mxu0 %v1728_v16 }
 0x202   : > { %2712 = vmatmul.mubr.f32.gmra.mxu1 %v1370_v50  ;;  %2779 = vmatprep.subr.mxu0 %v1727_v60  ;;  %v1723_v50 = vld [vmem:[%s4147_s4 + $0x20] sm:$0xff] }
 0x203   : > { %2714 = vmatprep.mubr.f32.mxu1 %v1371_v34  ;;  %2780 = vmatpush3.msra.mxu0 %v1727_v60  ;;  %v1720_v34 = vld [vmem:[%s4147_s4 + $0x8] sm:$0xff] }
 0x204   : > { %2781 = vmatprep.subr.mxu0 %v1726_v30 }
 0x205   : > { %2782 = vmatpush3.msra.mxu0 %v1726_v30 }
 0x206   : > { %2715 = vmatmul.mubr.f32.gmra.mxu1 %v1372_v25  ;;  %2783 = vmatprep.subr.mxu0 %v1725_v9 }
 0x207   : > { %2717 = vmatprep.mubr.f32.mxu1 %v1373_v7  ;;  %2784 = vmatpush3.msra.mxu0 %v1725_v9 }
 0x208   : > { %2785 = vmatprep.subr.mxu0 %v1724_v40 }
 0x209   : > { %2786 = vmatpush3.msra.mxu0 %v1724_v40 }
 0x20a   : > { %2718 = vmatmul.mubr.f32.gmra.mxu1 %v1374_v23  ;;  %2787 = vmatprep.subr.mxu0 %v1723_v50 }
 0x20b   : > { %2720 = vmatprep.mubr.f32.mxu1 %v1375_v44  ;;  %2788 = vmatpush3.msra.mxu0 %v1723_v50 }
 0x20c   : > { %2789 = vmatprep.subr.mxu0 %v1722_v54 }
 0x20d   : > { %2790 = vmatpush3.msra.mxu0 %v1722_v54 }
 0x20e   : > { %2721 = vmatmul.mubr.f32.gmra.mxu1 %v1376_v37  ;;  %2791 = vmatprep.subr.mxu0 %v1721_v63 }
 0x20f   : > { %2723 = vmatprep.mubr.f32.mxu1 %v1377_v36  ;;  %v2648_v35 = vpop.f32.mrf.mxu0  ;;  %2792 = vmatpush3.msra.mxu0 %v1721_v63 }
 0x210   : > { %v1274_v26 = vadd.f32 %v2648_v35, %v3741_v56  ;;  %2793 = vmatprep.subr.mxu0 %v1720_v34 }
 0x211   : > { %v1268_v43 = vpop.f32.mrf.mxu0  ;;  %2794 = vmatpush3.msra.mxu0 %v1720_v34 }
 0x212   : > { %2724 = vmatmul.mubr.f32.gmra.mxu1 %v1378_v51  ;;  %v1269_v24 = vadd.f32 %v3741_v56, %v1268_v43  ;;  %v1386_v47 = vmax.f32 %v1274_v26, 0.0  ;;  %2795 = vmatprep.subr.mxu0 %v1719_v1 }
 0x213   : > { %2726 = vmatprep.mubr.f32.mxu1 %v1379_v38  ;;  %2796 = vmatpush3.msra.mxu0 %v1719_v1 }
 0x214   : > { %v1385_v8 = vmax.f32 %v1269_v24, 0.0 }
 0x216   : > { %2727 = vmatmul.mubr.f32.gmra.mxu1 %v1380_v17 }
 0x217   : > { %2729 = vmatprep.mubr.f32.mxu1 %v1381_v12 }
 0x21a   : > { %2730 = vmatmul.mubr.f32.gmra.mxu1 %v1382_v57 }
 0x21b   : > { %2732 = vmatprep.mubr.f32.mxu1 %v1383_v46 }
 0x21e   : > { %2733 = vmatmul.mubr.f32.gmra.mxu1 %v1384_v6 }
 0x21f   : > { %2735 = vmatprep.mubr.f32.mxu1 %v1385_v8 }
 0x222   : > { %v2651_v52 = vpop.f32.mrf.mxu1  ;;  %2736 = vmatmul.mubr.f32.gmra.mxu1 %v1386_v47 }
 0x223   : > { %v1284_v32 = vadd.f32 %v2651_v52, %v3741_v56 }
 0x224   : > { %v1278_v39 = vpop.f32.mrf.mxu1 }
 0x225   : > { %v1279_v53 = vadd.f32 %v3741_v56, %v1278_v39  ;;  %v1388_v33 = vmax.f32 %v1284_v32, 0.0 }
 0x227   : > { %v1387_v18 = vmax.f32 %v1279_v53, 0.0 }
 0x229   : > { %2738 = vmatprep.mubr.f32.mxu1 %v1387_v18  ;;  %v3832_v18 = vld [vmem:[%s4148_s5 + $0x2] ss:$0 sm:$0xff] }
 0x22a   : > { %2739 = vmatmul.mubr.f32.gmra.mxu1 %v1388_v33 }
 0x235   : > { %v2654_v62 = vpop.f32.mrf.mxu1 }
 0x236   : > { %v1294_v15 = vadd.f32 %v2654_v62, %v3741_v56 }
 0x237   : > { %v1288_v27 = vpop.f32.mrf.mxu1 }
 0x238   : > { %v1289_v48 = vadd.f32 %v3741_v56, %v1288_v27  ;;  %v1390_v28 = vmax.f32 %v1294_v15, 0.0 }
 0x23a   : > { %v1389_v0 = vmax.f32 %v1289_v48, 0.0 }
 0x23c   : > { %2741 = vmatprep.mubr.f32.mxu1 %v1389_v0 }
 0x23d   : > { %2742 = vmatmul.mubr.f32.gmra.mxu1 %v1390_v28 }
 0x248   : > { %v2657_v25 = vpop.f32.mrf.mxu1 }
 0x249   : > { %v1304_v21 = vadd.f32 %v2657_v25, %v3741_v56 }
 0x24a   : > { %v1298_v4 = vpop.f32.mrf.mxu1 }
 0x24b   : > { %v1299_v7 = vadd.f32 %v3741_v56, %v1298_v4  ;;  %v1392_v3 = vmax.f32 %v1304_v21, 0.0 }
 0x24d   : > { %v1391_v2 = vmax.f32 %v1299_v7, 0.0 }
 0x24f   : > { %2744 = vmatprep.mubr.f32.mxu1 %v1391_v2 }
 0x250   : > { %2745 = vmatmul.mubr.f32.gmra.mxu1 %v1392_v3 }
 0x25b   : > { %v2660_v23 = vpop.f32.mrf.mxu1 }
 0x25c   : > { %v1314_v10 = vadd.f32 %v2660_v23, %v3741_v56 }
 0x25d   : > { %v1308_v44 = vpop.f32.mrf.mxu1 }
 0x25e   : > { %v1309_v45 = vadd.f32 %v3741_v56, %v1308_v44  ;;  %v1394_v37 = vmax.f32 %v1314_v10, 0.0 }
 0x260   : > { %v1393_v59 = vmax.f32 %v1309_v45, 0.0 }
 0x262   : > { %2747 = vmatprep.mubr.f32.mxu1 %v1393_v59 }
 0x263   : > { %2748 = vmatmul.mubr.f32.gmra.mxu1 %v1394_v37 }
 0x26e   : > { %v2663_v13 = vpop.f32.mrf.mxu1 }
 0x26f   : > { %v1324_v20 = vadd.f32 %v2663_v13, %v3741_v56 }
 0x270   : > { %v1318_v36 = vpop.f32.mrf.mxu1 }
 0x271   : > { %v1319_v22 = vadd.f32 %v3741_v56, %v1318_v36  ;;  %v1396_v41 = vmax.f32 %v1324_v20, 0.0 }
 0x273   : > { %v1395_v51 = vmax.f32 %v1319_v22, 0.0 }
 0x275   : > { %2750 = vmatprep.mubr.f32.mxu1 %v1395_v51 }
 0x276   : > { %2751 = vmatmul.mubr.f32.gmra.mxu1 %v1396_v41 }
 0x281   : > { %v2666_v42 = vpop.f32.mrf.mxu1 }
 0x282   : > { %v1334_v38 = vadd.f32 %v2666_v42, %v3741_v56 }
 0x283   : > { %v1328_v5 = vpop.f32.mrf.mxu1 }
 0x284   : > { %v1329_v35 = vadd.f32 %v3741_v56, %v1328_v5  ;;  %v1398_v29 = vmax.f32 %v1334_v38, 0.0 }
 0x286   : > { %v1397_v17 = vmax.f32 %v1329_v35, 0.0 }
 0x288   : > { %2753 = vmatprep.mubr.f32.mxu1 %v1397_v17 }
 0x289   : > { %2754 = vmatmul.mubr.f32.gmra.mxu1 %v1398_v29 }
 0x294   : > { %v2669_v12 = vpop.f32.mrf.mxu1 }
 0x295   : > { %v1344_v14 = vadd.f32 %v2669_v12, %v3741_v56 }
 0x296   : > { %v1338_v43 = vpop.f32.mrf.mxu1 }
 0x297   : > { %v1339_v57 = vadd.f32 %v3741_v56, %v1338_v43  ;;  %v1400_v46 = vmax.f32 %v1344_v14, 0.0 }
 0x299   : > { %v1399_v31 = vmax.f32 %v1339_v57, 0.0 }
 0x29b   : > { %2756 = vmatprep.mubr.f32.mxu1 %v1399_v31 }
 0x29c   : > { %2757 = vmatmul.mubr.f32.gmra.mxu1 %v1400_v46 }
 0x2a7   : > { %v2672_v24 = vpop.f32.mrf.mxu1 }
 0x2a8   : > { %v1354_v6 = vadd.f32 %v2672_v24, %v3741_v56 }
 0x2a9   : > { %v1348_v26 = vpop.f32.mrf.mxu1 }
 0x2aa   : > { %v1349_v19 = vadd.f32 %v3741_v56, %v1348_v26  ;;  %v1402_v47 = vmax.f32 %v1354_v6, 0.0 }
 0x2ac   : > { %v1401_v8 = vmax.f32 %v1349_v19, 0.0 }
 0x2ae   : > { %2759 = vmatprep.mubr.f32.mxu1 %v1401_v8 }
 0x2af   : > { %2760 = vmatmul.mubr.f32.gmra.mxu1 %v1402_v47 }
 0x2ba   : > { %v2675_v52 = vpop.f32.mrf.mxu1 }
 0x2bb   : > { %v1364_v32 = vadd.f32 %v2675_v52, %v3741_v56 }
 0x2bc   : > { %v1358_v39 = vpop.f32.mrf.mxu1 }
 0x2bd   : > { %v1359_v53 = vadd.f32 %v3741_v56, %v1358_v39  ;;  %v1404_v11 = vmax.f32 %v1364_v32, 0.0 }
 0x2be   : > { %v2710_v55 = vpop.f32.mrf.mxu1 }
 0x2bf   : > { %v1403_v33 = vmax.f32 %v1359_v53, 0.0  ;;  %v1498_v49 = vadd.f32 %v2710_v55, %v3832_v18 }
 0x2c0   : > { %v1492_v61 = vpop.f32.mrf.mxu1 }
 0x2c1   : > { %v1493_v58 = vadd.f32 %v3832_v18, %v1492_v61  ;;  %2762 = vmatprep.mubr.f32.mxu1 %v1403_v33  ;;  %v1682_v30 = vmax.f32 %v1498_v49, 0.0 }
 0x2c2   : > { %v2713_v16 = vpop.f32.mrf.mxu1  ;;  %2763 = vmatmul.mubr.f32.gmra.mxu1 %v1404_v11 }
 0x2c3   : > { %v1681_v60 = vmax.f32 %v1493_v58, 0.0  ;;  %v1508_v56 = vadd.f32 %v2713_v16, %v3832_v18 }
 0x2c4   : > { %v1502_v62 = vpop.f32.mrf.mxu1 }
 0x2c5   : > { %v1503_v9 = vadd.f32 %v3832_v18, %v1502_v62  ;;  %2797 = vmatprep.mubr.f32.mxu0 %v1681_v60  ;;  %v1684_v48 = vmax.f32 %v1508_v56, 0.0 }
 0x2c6   : > { %v2716_v15 = vpop.f32.mrf.mxu1  ;;  %2798 = vmatmul.mubr.f32.vlgmr.msra.gmra.mxu0 %v1682_v30 }
 0x2c7   : > { %v1683_v27 = vmax.f32 %v1503_v9, 0.0  ;;  %v1518_v40 = vadd.f32 %v2716_v15, %v3832_v18 }
 0x2c8   : > { %v1512_v0 = vpop.f32.mrf.mxu1 }
 0x2c9   : > { %v1513_v28 = vadd.f32 %v3832_v18, %v1512_v0  ;;  %2800 = vmatprep.mubr.f32.mxu0 %v1683_v27  ;;  %v1686_v63 = vmax.f32 %v1518_v40, 0.0 }
 0x2ca   : > { %v2719_v50 = vpop.f32.mrf.mxu1  ;;  %2801 = vmatmul.mubr.f32.gmra.mxu0 %v1684_v48 }
 0x2cb   : > { %v1685_v54 = vmax.f32 %v1513_v28, 0.0  ;;  %v1528_v34 = vadd.f32 %v2719_v50, %v3832_v18 }
 0x2cc   : > { %v1522_v1 = vpop.f32.mrf.mxu1 }
 0x2cd   : > { %v1523_v25 = vadd.f32 %v3832_v18, %v1522_v1  ;;  %2803 = vmatprep.mubr.f32.mxu0 %v1685_v54  ;;  %v1688_v7 = vmax.f32 %v1528_v34, 0.0 }
 0x2ce   : > { %v2722_v21 = vpop.f32.mrf.mxu1  ;;  %2804 = vmatmul.mubr.f32.gmra.mxu0 %v1686_v63 }
 0x2cf   : > { %v1687_v4 = vmax.f32 %v1523_v25, 0.0  ;;  %v1538_v2 = vadd.f32 %v2722_v21, %v3832_v18 }
 0x2d0   : > { %v1532_v3 = vpop.f32.mrf.mxu1 }
 0x2d1   : > { %v1533_v23 = vadd.f32 %v3832_v18, %v1532_v3  ;;  %2806 = vmatprep.mubr.f32.mxu0 %v1687_v4  ;;  %v1690_v45 = vmax.f32 %v1538_v2, 0.0 }
 0x2d2   : > { %v2725_v10 = vpop.f32.mrf.mxu1  ;;  %2807 = vmatmul.mubr.f32.gmra.mxu0 %v1688_v7 }
 0x2d3   : > { %v1689_v44 = vmax.f32 %v1533_v23, 0.0  ;;  %v1548_v59 = vadd.f32 %v2725_v10, %v3832_v18 }
 0x2d4   : > { %v1542_v37 = vpop.f32.mrf.mxu1 }
 0x2d5   : > { %v1543_v13 = vadd.f32 %v3832_v18, %v1542_v37  ;;  %2809 = vmatprep.mubr.f32.mxu0 %v1689_v44  ;;  %v1692_v22 = vmax.f32 %v1548_v59, 0.0 }
 0x2d6   : > { %v2728_v20 = vpop.f32.mrf.mxu1  ;;  %2810 = vmatmul.mubr.f32.gmra.mxu0 %v1690_v45 }
 0x2d7   : > { %v1691_v36 = vmax.f32 %v1543_v13, 0.0  ;;  %v1558_v51 = vadd.f32 %v2728_v20, %v3832_v18 }
 0x2d8   : > { %v1552_v41 = vpop.f32.mrf.mxu1 }
 0x2d9   : > { %v1553_v42 = vadd.f32 %v3832_v18, %v1552_v41  ;;  %2812 = vmatprep.mubr.f32.mxu0 %v1691_v36  ;;  %v1694_v35 = vmax.f32 %v1558_v51, 0.0 }
 0x2da   : > { %v2731_v38 = vpop.f32.mrf.mxu1  ;;  %2813 = vmatmul.mubr.f32.gmra.mxu0 %v1692_v22 }
 0x2db   : > { %v1693_v5 = vmax.f32 %v1553_v42, 0.0  ;;  %v1568_v17 = vadd.f32 %v2731_v38, %v3832_v18 }
 0x2dc   : > { %v1562_v29 = vpop.f32.mrf.mxu1 }
 0x2dd   : > { %v1563_v12 = vadd.f32 %v3832_v18, %v1562_v29  ;;  %2815 = vmatprep.mubr.f32.mxu0 %v1693_v5  ;;  %v1696_v57 = vmax.f32 %v1568_v17, 0.0 }
 0x2de   : > { %v2734_v14 = vpop.f32.mrf.mxu1  ;;  %2816 = vmatmul.mubr.f32.gmra.mxu0 %v1694_v35 }
 0x2df   : > { %v1695_v43 = vmax.f32 %v1563_v12, 0.0  ;;  %v1578_v31 = vadd.f32 %v2734_v14, %v3832_v18 }
 0x2e0   : > { %v1572_v46 = vpop.f32.mrf.mxu1 }
 0x2e1   : > { %v1573_v24 = vadd.f32 %v3832_v18, %v1572_v46  ;;  %2818 = vmatprep.mubr.f32.mxu0 %v1695_v43  ;;  %v1698_v19 = vmax.f32 %v1578_v31, 0.0 }
 0x2e2   : > { %v2737_v6 = vpop.f32.mrf.mxu1  ;;  %2819 = vmatmul.mubr.f32.gmra.mxu0 %v1696_v57  ;;  %v3875_v57 = vld [vmem:[%s4148_s5 + $0x3] ss:$0 sm:$0xff] }
 0x2e3   : > { %v1697_v26 = vmax.f32 %v1573_v24, 0.0  ;;  %v1588_v8 = vadd.f32 %v2737_v6, %v3832_v18 }
 0x2e4   : > { %v1582_v47 = vpop.f32.mrf.mxu1 }
 0x2e5   : > { %v1583_v52 = vadd.f32 %v3832_v18, %v1582_v47  ;;  %2821 = vmatprep.mubr.f32.mxu0 %v1697_v26  ;;  %v1700_v39 = vmax.f32 %v1588_v8, 0.0 }
 0x2e6   : > { %2822 = vmatmul.mubr.f32.gmra.mxu0 %v1698_v19 }
 0x2e7   : > { %v1699_v32 = vmax.f32 %v1583_v52, 0.0 }
 0x2e9   : > { %2824 = vmatprep.mubr.f32.mxu0 %v1699_v32 }
 0x2ea   : > { %v2740_v53 = vpop.f32.mrf.mxu1  ;;  %2825 = vmatmul.mubr.f32.gmra.mxu0 %v1700_v39 }
 0x2eb   : > { %v1598_v55 = vadd.f32 %v2740_v53, %v3832_v18 }
 0x2ec   : > { %v1592_v33 = vpop.f32.mrf.mxu1 }
 0x2ed   : > { %v1593_v11 = vadd.f32 %v3832_v18, %v1592_v33  ;;  %v1702_v61 = vmax.f32 %v1598_v55, 0.0 }
 0x2ef   : > { %v1701_v49 = vmax.f32 %v1593_v11, 0.0 }
 0x2f1   : > { %2827 = vmatprep.mubr.f32.mxu0 %v1701_v49 }
 0x2f2   : > { %2828 = vmatmul.mubr.f32.gmra.mxu0 %v1702_v61 }
 0x2fd   : > { %v2743_v58 = vpop.f32.mrf.mxu1 }
 0x2fe   : > { %v1608_v16 = vadd.f32 %v2743_v58, %v3832_v18 }
 0x2ff   : > { %v1602_v60 = vpop.f32.mrf.mxu1 }
 0x300   : > { %v1603_v30 = vadd.f32 %v3832_v18, %v1602_v60  ;;  %v1704_v62 = vmax.f32 %v1608_v16, 0.0 }
 0x302   : > { %v1703_v56 = vmax.f32 %v1603_v30, 0.0 }
 0x304   : > { %2830 = vmatprep.mubr.f32.mxu0 %v1703_v56 }
 0x305   : > { %2831 = vmatmul.mubr.f32.gmra.mxu0 %v1704_v62 }
 0x310   : > { %v2746_v9 = vpop.f32.mrf.mxu1 }
 0x311   : > { %v1618_v15 = vadd.f32 %v2746_v9, %v3832_v18 }
 0x312   : > { %v1612_v27 = vpop.f32.mrf.mxu1 }
 0x313   : > { %v1613_v48 = vadd.f32 %v3832_v18, %v1612_v27  ;;  %v1706_v0 = vmax.f32 %v1618_v15, 0.0 }
 0x315   : > { %v1705_v40 = vmax.f32 %v1613_v48, 0.0 }
 0x317   : > { %2833 = vmatprep.mubr.f32.mxu0 %v1705_v40 }
 0x318   : > { %2834 = vmatmul.mubr.f32.gmra.mxu0 %v1706_v0 }
 0x323   : > { %v2749_v28 = vpop.f32.mrf.mxu1 }
 0x324   : > { %v1628_v50 = vadd.f32 %v2749_v28, %v3832_v18 }
 0x325   : > { %v1622_v54 = vpop.f32.mrf.mxu1 }
 0x326   : > { %v1623_v63 = vadd.f32 %v3832_v18, %v1622_v54  ;;  %v1708_v1 = vmax.f32 %v1628_v50, 0.0 }
 0x328   : > { %v1707_v34 = vmax.f32 %v1623_v63, 0.0 }
 0x32a   : > { %2836 = vmatprep.mubr.f32.mxu0 %v1707_v34 }
 0x32b   : > { %2837 = vmatmul.mubr.f32.gmra.mxu0 %v1708_v1 }
 0x336   : > { %v2752_v25 = vpop.f32.mrf.mxu1 }
 0x337   : > { %v1638_v21 = vadd.f32 %v2752_v25, %v3832_v18 }
 0x338   : > { %v1632_v4 = vpop.f32.mrf.mxu1 }
 0x339   : > { %v1633_v7 = vadd.f32 %v3832_v18, %v1632_v4  ;;  %v1710_v3 = vmax.f32 %v1638_v21, 0.0 }
 0x33b   : > { %v1709_v2 = vmax.f32 %v1633_v7, 0.0 }
 0x33d   : > { %2839 = vmatprep.mubr.f32.mxu0 %v1709_v2 }
 0x33e   : > { %2840 = vmatmul.mubr.f32.gmra.mxu0 %v1710_v3 }
 0x349   : > { %v2755_v23 = vpop.f32.mrf.mxu1 }
 0x34a   : > { %v1648_v10 = vadd.f32 %v2755_v23, %v3832_v18 }
 0x34b   : > { %v1642_v44 = vpop.f32.mrf.mxu1 }
 0x34c   : > { %v1643_v45 = vadd.f32 %v3832_v18, %v1642_v44  ;;  %v1712_v37 = vmax.f32 %v1648_v10, 0.0 }
 0x34e   : > { %v1711_v59 = vmax.f32 %v1643_v45, 0.0 }
 0x350   : > { %2842 = vmatprep.mubr.f32.mxu0 %v1711_v59 }
 0x351   : > { %2843 = vmatmul.mubr.f32.gmra.mxu0 %v1712_v37 }
 0x35c   : > { %v2758_v13 = vpop.f32.mrf.mxu1 }
 0x35d   : > { %v1658_v20 = vadd.f32 %v2758_v13, %v3832_v18 }
 0x35e   : > { %v1652_v36 = vpop.f32.mrf.mxu1 }
 0x35f   : > { %v1653_v22 = vadd.f32 %v3832_v18, %v1652_v36  ;;  %v1714_v41 = vmax.f32 %v1658_v20, 0.0 }
 0x361   : > { %v1713_v51 = vmax.f32 %v1653_v22, 0.0 }
 0x363   : > { %2845 = vmatprep.mubr.f32.mxu0 %v1713_v51 }
 0x364   : > { %2846 = vmatmul.mubr.f32.gmra.mxu0 %v1714_v41 }
 0x36f   : > { %v2761_v42 = vpop.f32.mrf.mxu1 }
 0x370   : > { %v1668_v38 = vadd.f32 %v2761_v42, %v3832_v18 }
 0x371   : > { %v1662_v5 = vpop.f32.mrf.mxu1 }
 0x372   : > { %v1663_v35 = vadd.f32 %v3832_v18, %v1662_v5  ;;  %v1716_v29 = vmax.f32 %v1668_v38, 0.0 }
 0x374   : > { %v1715_v17 = vmax.f32 %v1663_v35, 0.0 }
 0x376   : > { %2848 = vmatprep.mubr.f32.mxu0 %v1715_v17 }
 0x377   : > { %2849 = vmatmul.mubr.f32.gmra.mxu0 %v1716_v29 }
 0x382   : > { %v2764_v12 = vpop.f32.mrf.mxu1 }
 0x383   : > { %v1678_v14 = vadd.f32 %v2764_v12, %v3832_v18 }
 0x384   : > { %v1672_v43 = vpop.f32.mrf.mxu1 }
 0x385   : > { %v1673_v31 = vadd.f32 %v3832_v18, %v1672_v43  ;;  %v1718_v26 = vmax.f32 %v1678_v14, 0.0 }
 0x386   : > { %v2799_v46 = vpop.f32.mrf.mxu0 }
 0x387   : > { %v1717_v24 = vmax.f32 %v1673_v31, 0.0  ;;  %v1812_v6 = vadd.f32 %v2799_v46, %v3875_v57 }
 0x388   : > { %v1806_v19 = vpop.f32.mrf.mxu0 }
 0x389   : > { %1997 = vst.msk [vmem:[%s3879_s21 + $0x8] sm:$0xff] %vm1995_vm0, %v1812_v6  ;;  %v1807_v8 = vadd.f32 %v3875_v57, %v1806_v19  ;;  %2851 = vmatprep.mubr.f32.mxu0 %v1717_v24 }
 0x38a   : > { %v2802_v18 = vpop.f32.mrf.mxu0  ;;  %2852 = vmatmul.mubr.f32.gmra.mxu0 %v1718_v26 }
 0x38b   : > { %1996 = vst.msk [vmem:[%s3879_s21] sm:$0xff] %vm1995_vm0, %v1807_v8  ;;  %v1822_v47 = vadd.f32 %v2802_v18, %v3875_v57 }
 0x38c   : > { %v1816_v52 = vpop.f32.mrf.mxu0 }
 0x38d   : > { %1999 = vst.msk [vmem:[%s3879_s21 + $0x18] sm:$0xff] %vm1995_vm0, %v1822_v47  ;;  %v1817_v32 = vadd.f32 %v3875_v57, %v1816_v52 }
 0x38e   : > { %v2805_v39 = vpop.f32.mrf.mxu0 }
 0x38f   : > { %1998 = vst.msk [vmem:[%s3879_s21 + $0x10] sm:$0xff] %vm1995_vm0, %v1817_v32  ;;  %v1832_v53 = vadd.f32 %v2805_v39, %v3875_v57 }
 0x390   : > { %v1826_v55 = vpop.f32.mrf.mxu0 }
 0x391   : > { %2001 = vst.msk [vmem:[%s3879_s21 + $0x28] sm:$0xff] %vm1995_vm0, %v1832_v53  ;;  %v1827_v33 = vadd.f32 %v3875_v57, %v1826_v55 }
 0x392   : > { %v2808_v11 = vpop.f32.mrf.mxu0 }
 0x393   : > { %2000 = vst.msk [vmem:[%s3879_s21 + $0x20] sm:$0xff] %vm1995_vm0, %v1827_v33  ;;  %v1842_v49 = vadd.f32 %v2808_v11, %v3875_v57 }
 0x394   : > { %v1836_v61 = vpop.f32.mrf.mxu0 }
 0x395   : > { %2003 = vst.msk [vmem:[%s3879_s21 + $0x38] sm:$0xff] %vm1995_vm0, %v1842_v49  ;;  %v1837_v58 = vadd.f32 %v3875_v57, %v1836_v61 }
 0x396   : > { %v2811_v16 = vpop.f32.mrf.mxu0 }
 0x397   : > { %2002 = vst.msk [vmem:[%s3879_s21 + $0x30] sm:$0xff] %vm1995_vm0, %v1837_v58  ;;  %v1852_v60 = vadd.f32 %v2811_v16, %v3875_v57 }
 0x398   : > { %v1846_v30 = vpop.f32.mrf.mxu0 }
 0x399   : > { %2005 = vst.msk [vmem:[%s3879_s21 + $0x48] sm:$0xff] %vm1995_vm0, %v1852_v60  ;;  %v1847_v56 = vadd.f32 %v3875_v57, %v1846_v30 }
 0x39a   : > { %v2814_v62 = vpop.f32.mrf.mxu0 }
 0x39b   : > { %2004 = vst.msk [vmem:[%s3879_s21 + $0x40] sm:$0xff] %vm1995_vm0, %v1847_v56  ;;  %v1862_v9 = vadd.f32 %v2814_v62, %v3875_v57 }
 0x39c   : > { %v1856_v15 = vpop.f32.mrf.mxu0 }
 0x39d   : > { %2007 = vst.msk [vmem:[%s3879_s21 + $0x58] sm:$0xff] %vm1995_vm0, %v1862_v9  ;;  %v1857_v27 = vadd.f32 %v3875_v57, %v1856_v15 }
 0x39e   : > { %v2817_v48 = vpop.f32.mrf.mxu0 }
 0x39f   : > { %2006 = vst.msk [vmem:[%s3879_s21 + $0x50] sm:$0xff] %vm1995_vm0, %v1857_v27  ;;  %v1872_v40 = vadd.f32 %v2817_v48, %v3875_v57 }
 0x3a0   : > { %v1866_v0 = vpop.f32.mrf.mxu0 }
 0x3a1   : > { %2009 = vst.msk [vmem:[%s3879_s21 + $0x68] sm:$0xff] %vm1995_vm0, %v1872_v40  ;;  %v1867_v28 = vadd.f32 %v3875_v57, %v1866_v0 }
 0x3a2   : > { %v2820_v50 = vpop.f32.mrf.mxu0 }
 0x3a3   : > { %2008 = vst.msk [vmem:[%s3879_s21 + $0x60] sm:$0xff] %vm1995_vm0, %v1867_v28  ;;  %v1882_v54 = vadd.f32 %v2820_v50, %v3875_v57 }
 0x3a4   : > { %v1876_v63 = vpop.f32.mrf.mxu0 }
 0x3a5   : > { %2011 = vst.msk [vmem:[%s3879_s21 + $0x78] sm:$0xff] %vm1995_vm0, %v1882_v54  ;;  %v1877_v34 = vadd.f32 %v3875_v57, %v1876_v63 }
 0x3a6   : > { %v2823_v1 = vpop.f32.mrf.mxu0 }
 0x3a7   : > { %2010 = vst.msk [vmem:[%s3879_s21 + $0x70] sm:$0xff] %vm1995_vm0, %v1877_v34  ;;  %v1892_v25 = vadd.f32 %v2823_v1, %v3875_v57 }
 0x3a8   : > { %v1886_v21 = vpop.f32.mrf.mxu0 }
 0x3a9   : > { %2013 = vst.msk [vmem:[%s3879_s21 + $0x88] sm:$0xff] %vm1995_vm0, %v1892_v25  ;;  %v1887_v4 = vadd.f32 %v3875_v57, %v1886_v21 }
 0x3aa   : > { %v2826_v7 = vpop.f32.mrf.mxu0 }
 0x3ab   : > { %2012 = vst.msk [vmem:[%s3879_s21 + $0x80] sm:$0xff] %vm1995_vm0, %v1887_v4  ;;  %v1902_v2 = vadd.f32 %v2826_v7, %v3875_v57 }
 0x3ac   : > { %v1896_v3 = vpop.f32.mrf.mxu0 }
 0x3ad   : > { %2015 = vst.msk [vmem:[%s3879_s21 + $0x98] sm:$0xff] %vm1995_vm0, %v1902_v2  ;;  %v1897_v23 = vadd.f32 %v3875_v57, %v1896_v3 }
 0x3af   : > { %2014 = vst.msk [vmem:[%s3879_s21 + $0x90] sm:$0xff] %vm1995_vm0, %v1897_v23 }
 0x3b2   : > { %v2829_v10 = vpop.f32.mrf.mxu0 }
 0x3b3   : > { %v1912_v44 = vadd.f32 %v2829_v10, %v3875_v57 }
 0x3b4   : > { %v1906_v45 = vpop.f32.mrf.mxu0 }
 0x3b5   : > { %2017 = vst.msk [vmem:[%s3879_s21 + $0xa8] sm:$0xff] %vm1995_vm0, %v1912_v44  ;;  %v1907_v59 = vadd.f32 %v3875_v57, %v1906_v45 }
 0x3b7   : > { %2016 = vst.msk [vmem:[%s3879_s21 + $0xa0] sm:$0xff] %vm1995_vm0, %v1907_v59 }
 0x3c5   : > { %v2832_v37 = vpop.f32.mrf.mxu0 }
 0x3c6   : > { %v1922_v13 = vadd.f32 %v2832_v37, %v3875_v57 }
 0x3c7   : > { %v1916_v20 = vpop.f32.mrf.mxu0 }
 0x3c8   : > { %2019 = vst.msk [vmem:[%s3879_s21 + $0xb8] sm:$0xff] %vm1995_vm0, %v1922_v13  ;;  %v1917_v36 = vadd.f32 %v3875_v57, %v1916_v20 }
 0x3ca   : > { %2018 = vst.msk [vmem:[%s3879_s21 + $0xb0] sm:$0xff] %vm1995_vm0, %v1917_v36 }
 0x3d8   : > { %v2835_v22 = vpop.f32.mrf.mxu0 }
 0x3d9   : > { %v1932_v51 = vadd.f32 %v2835_v22, %v3875_v57 }
 0x3da   : > { %v1926_v41 = vpop.f32.mrf.mxu0 }
 0x3db   : > { %2021 = vst.msk [vmem:[%s3879_s21 + $0xc8] sm:$0xff] %vm1995_vm0, %v1932_v51  ;;  %v1927_v42 = vadd.f32 %v3875_v57, %v1926_v41 }
 0x3dd   : > { %2020 = vst.msk [vmem:[%s3879_s21 + $0xc0] sm:$0xff] %vm1995_vm0, %v1927_v42 }
 0x3eb   : > { %v2838_v38 = vpop.f32.mrf.mxu0 }
 0x3ec   : > { %v1942_v5 = vadd.f32 %v2838_v38, %v3875_v57 }
 0x3ed   : > { %v1936_v35 = vpop.f32.mrf.mxu0 }
 0x3ee   : > { %2023 = vst.msk [vmem:[%s3879_s21 + $0xd8] sm:$0xff] %vm1995_vm0, %v1942_v5  ;;  %v1937_v17 = vadd.f32 %v3875_v57, %v1936_v35 }
 0x3f0   : > { %2022 = vst.msk [vmem:[%s3879_s21 + $0xd0] sm:$0xff] %vm1995_vm0, %v1937_v17 }
 0x3fe   : > { %v2841_v29 = vpop.f32.mrf.mxu0 }
 0x3ff   : > { %v1952_v12 = vadd.f32 %v2841_v29, %v3875_v57 }
 0x400   : > { %v1946_v14 = vpop.f32.mrf.mxu0 }
 0x401   : > { %2025 = vst.msk [vmem:[%s3879_s21 + $0xe8] sm:$0xff] %vm1995_vm0, %v1952_v12  ;;  %v1947_v43 = vadd.f32 %v3875_v57, %v1946_v14 }
 0x403   : > { %2024 = vst.msk [vmem:[%s3879_s21 + $0xe0] sm:$0xff] %vm1995_vm0, %v1947_v43 }
 0x411   : > { %v2844_v31 = vpop.f32.mrf.mxu0 }
 0x412   : > { %v1962_v46 = vadd.f32 %v2844_v31, %v3875_v57 }
 0x413   : > { %v1956_v24 = vpop.f32.mrf.mxu0 }
 0x414   : > { %2027 = vst.msk [vmem:[%s3879_s21 + $0xf8] sm:$0xff] %vm1995_vm0, %v1962_v46  ;;  %v1957_v6 = vadd.f32 %v3875_v57, %v1956_v24 }
 0x416   : > { %2026 = vst.msk [vmem:[%s3879_s21 + $0xf0] sm:$0xff] %vm1995_vm0, %v1957_v6 }
 0x424   : > { %v2847_v26 = vpop.f32.mrf.mxu0 }
 0x425   : > { %v1972_v19 = vadd.f32 %v2847_v26, %v3875_v57 }
 0x426   : > { %v1966_v8 = vpop.f32.mrf.mxu0 }
 0x427   : > { %2029 = vst.msk [vmem:[%s3879_s21 + $0x108] sm:$0xff] %vm1995_vm0, %v1972_v19  ;;  %v1967_v18 = vadd.f32 %v3875_v57, %v1966_v8 }
 0x429   : > { %2028 = vst.msk [vmem:[%s3879_s21 + $0x100] sm:$0xff] %vm1995_vm0, %v1967_v18 }
 0x437   : > { %v2850_v47 = vpop.f32.mrf.mxu0 }
 0x438   : > { %v1982_v52 = vadd.f32 %v2850_v47, %v3875_v57 }
 0x439   : > { %v1976_v32 = vpop.f32.mrf.mxu0 }
 0x43a   : > { %2031 = vst.msk [vmem:[%s3879_s21 + $0x118] sm:$0xff] %vm1995_vm0, %v1982_v52  ;;  %v1977_v39 = vadd.f32 %v3875_v57, %v1976_v32 }
 0x43c   : > { %2030 = vst.msk [vmem:[%s3879_s21 + $0x110] sm:$0xff] %vm1995_vm0, %v1977_v39 }
 0x44a   : > { %v2853_v53 = vpop.f32.mrf.mxu0 }
 0x44b   : > { %v1992_v55 = vadd.f32 %v2853_v53, %v3875_v57  ;;  %2040 = sbr.rel (!%p3199_p4) target bundleno = 1169 (0x491), region = 48 }
 0x44c   : > { %v1986_v33 = vpop.f32.mrf.mxu0 }
 0x44d   : > { %2033 = vst.msk [vmem:[%s3879_s21 + $0x128] sm:$0xff] %vm1995_vm0, %v1992_v55  ;;  %v1987_v11 = vadd.f32 %v3875_v57, %v1986_v33 }
 0x44f   : > { %2032 = vst.msk [vmem:[%s3879_s21 + $0x120] sm:$0xff] %vm1995_vm0, %v1987_v11 }
 0x450   : > { %s4160_s15 = smov (!%p2043_p8, %s2042_s15), 38 }
 0x451   : > { %s2412_s20 = sshll.u32 %s4160_s15, 7 }
 0x452   : > { %p2415_p9 = scmp.eq.s32.totalorder %s2412_s20, 0 }
 0x453   : > { %3044 = sdivrem.u32 (!%p2415_p9), %s4160_s15, 38 }
 0x454   : > { %2051 = sbr.rel (%p2415_p9) target bundleno = 1169 (0x491), region = 52 }
 0x45c   : > { %s4007_s29 = spop.drf %3044 }
 0x45d   : > { %p2416_p10 = scmp.le.s32.totalorder %s4007_s29, 0 }
 0x45e   : > { %s4151_s24 = smov (!%p2416_p10), %s4001_s19  ;;  %s4152_s30 = smov (!%p2416_p10), %s3879_s21 }
 0x45f   : > { %2356 = sbr.rel (%p2416_p10) target bundleno = 1144 (0x478), region = 128  ;;  %s4016_s23 = smov (!%p2416_p10), 0  }
 0x460   : > { %s4018_s26 = smov (!%p2416_p10), 0  }
 0x464 LB: >> { %v2190_v57 = vld [vmem:[%s3110_s30] sm:$0xff]  ;;  %v2192_v49 = vld [vmem:[%s3110_s30 + $0x8] sm:$0xff]  ;;  %v2194_v61 = vld [vmem:[%s3110_s30 + $0x10] sm:$0xff]  ;;  %s2266_s27 = sadd.s32 1, %s3114_s23  ;;  %s2184_s26 = sadd.s32 1, %s3118_s26   ;;  %s3118_s26 = sphi %s4018_s26, %s2184_s26   ;;  %s3114_s23 = sphi %s4016_s23, %s4155_s23   ;;  %s3110_s30 = sphi %s4152_s30, %s4154_s30   ;;  %s3106_s24 = sphi %s4151_s24, %s4153_s24  }
 0x465   : >> { %2191 = vst [vmem:[%s3106_s24] sm:$0xff] %v2190_v57  ;;  %2193 = vst [vmem:[%s3106_s24 + $0x8] sm:$0xff] %v2192_v49  ;;  %v2196_v58 = vld [vmem:[%s3110_s30 + $0x18] sm:$0xff]  ;;  %v2198_v16 = vld [vmem:[%s3110_s30 + $0x20] sm:$0xff]  ;;  %p2267_p11 = scmp.ge.s32.totalorder %s2266_s27, %s4007_s29  ;;  %p2183_p12 = scmp.ge.s32.totalorder %s2184_s26, %s4007_s29 }
 0x466   : >> { %2195 = vst [vmem:[%s3106_s24 + $0x10] sm:$0xff] %v2194_v61  ;;  %v2200_v60 = vld [vmem:[%s3110_s30 + $0x28] sm:$0xff]  ;;  %2197 = vst [vmem:[%s3106_s24 + $0x18] sm:$0xff] %v2196_v58  ;;  %v2202_v30 = vld [vmem:[%s3110_s30 + $0x30] sm:$0xff] }
 0x467   : >> { %2199 = vst [vmem:[%s3106_s24 + $0x20] sm:$0xff] %v2198_v16  ;;  %2201 = vst [vmem:[%s3106_s24 + $0x28] sm:$0xff] %v2200_v60  ;;  %v2204_v56 = vld [vmem:[%s3110_s30 + $0x38] sm:$0xff]  ;;  %v2206_v62 = vld [vmem:[%s3110_s30 + $0x40] sm:$0xff]  ;;  %s4162_s27 = smov (%p2267_p11, %s2266_s27), 0 }
 0x468   : >> { %2203 = vst [vmem:[%s3106_s24 + $0x30] sm:$0xff] %v2202_v30  ;;  %2205 = vst [vmem:[%s3106_s24 + $0x38] sm:$0xff] %v2204_v56  ;;  %v2208_v9 = vld [vmem:[%s3110_s30 + $0x48] sm:$0xff]  ;;  %v2210_v15 = vld [vmem:[%s3110_s30 + $0x50] sm:$0xff]  ;;  %s2269_s7 = smul.u32 304, %s4162_s27  ;;  %s4155_s23 = smov %s4162_s27 }
 0x469   : >> { %2207 = vst [vmem:[%s3106_s24 + $0x40] sm:$0xff] %v2206_v62  ;;  %v2212_v27 = vld [vmem:[%s3110_s30 + $0x58] sm:$0xff]  ;;  %2209 = vst [vmem:[%s3106_s24 + $0x48] sm:$0xff] %v2208_v9  ;;  %v2214_v48 = vld [vmem:[%s3110_s30 + $0x60] sm:$0xff] }
 0x46a   : >> { %2211 = vst [vmem:[%s3106_s24 + $0x50] sm:$0xff] %v2210_v15  ;;  %2213 = vst [vmem:[%s3106_s24 + $0x58] sm:$0xff] %v2212_v27  ;;  %v2216_v40 = vld [vmem:[%s3110_s30 + $0x68] sm:$0xff]  ;;  %v2218_v0 = vld [vmem:[%s3110_s30 + $0x70] sm:$0xff]  ;;  %s4080_s8 = scalar_lea.vmem %s3879_s21, %s2269_s7 [#allocation2]   ;;  %s4083_s9 = scalar_lea.vmem %s4001_s19, %s2269_s7  }
 0x46b   : >> { %2215 = vst [vmem:[%s3106_s24 + $0x60] sm:$0xff] %v2214_v48  ;;  %2217 = vst [vmem:[%s3106_s24 + $0x68] sm:$0xff] %v2216_v40  ;;  %v2220_v28 = vld [vmem:[%s3110_s30 + $0x78] sm:$0xff]  ;;  %v2222_v50 = vld [vmem:[%s3110_s30 + $0x80] sm:$0xff] }
 0x46c   : >> { %2219 = vst [vmem:[%s3106_s24 + $0x70] sm:$0xff] %v2218_v0  ;;  %v2224_v54 = vld [vmem:[%s3110_s30 + $0x88] sm:$0xff]  ;;  %2221 = vst [vmem:[%s3106_s24 + $0x78] sm:$0xff] %v2220_v28  ;;  %v2226_v63 = vld [vmem:[%s3110_s30 + $0x90] sm:$0xff] }
 0x46d   : >> { %2223 = vst [vmem:[%s3106_s24 + $0x80] sm:$0xff] %v2222_v50  ;;  %2225 = vst [vmem:[%s3106_s24 + $0x88] sm:$0xff] %v2224_v54  ;;  %v2228_v34 = vld [vmem:[%s3110_s30 + $0x98] sm:$0xff]  ;;  %v2230_v1 = vld [vmem:[%s3110_s30 + $0xa0] sm:$0xff] }
 0x46e   : >> { %2227 = vst [vmem:[%s3106_s24 + $0x90] sm:$0xff] %v2226_v63  ;;  %2229 = vst [vmem:[%s3106_s24 + $0x98] sm:$0xff] %v2228_v34  ;;  %v2232_v25 = vld [vmem:[%s3110_s30 + $0xa8] sm:$0xff]  ;;  %v2234_v21 = vld [vmem:[%s3110_s30 + $0xb0] sm:$0xff] }
 0x46f   : >> { %2231 = vst [vmem:[%s3106_s24 + $0xa0] sm:$0xff] %v2230_v1  ;;  %v2236_v4 = vld [vmem:[%s3110_s30 + $0xb8] sm:$0xff]  ;;  %2233 = vst [vmem:[%s3106_s24 + $0xa8] sm:$0xff] %v2232_v25  ;;  %v2238_v7 = vld [vmem:[%s3110_s30 + $0xc0] sm:$0xff] }
 0x470   : >> { %2235 = vst [vmem:[%s3106_s24 + $0xb0] sm:$0xff] %v2234_v21  ;;  %2237 = vst [vmem:[%s3106_s24 + $0xb8] sm:$0xff] %v2236_v4  ;;  %v2240_v2 = vld [vmem:[%s3110_s30 + $0xc8] sm:$0xff]  ;;  %v2242_v3 = vld [vmem:[%s3110_s30 + $0xd0] sm:$0xff] }
 0x471   : >> { %2239 = vst [vmem:[%s3106_s24 + $0xc0] sm:$0xff] %v2238_v7  ;;  %2241 = vst [vmem:[%s3106_s24 + $0xc8] sm:$0xff] %v2240_v2  ;;  %v2244_v23 = vld [vmem:[%s3110_s30 + $0xd8] sm:$0xff]  ;;  %v2246_v10 = vld [vmem:[%s3110_s30 + $0xe0] sm:$0xff] }
 0x472   : >> { %2243 = vst [vmem:[%s3106_s24 + $0xd0] sm:$0xff] %v2242_v3  ;;  %v2248_v44 = vld [vmem:[%s3110_s30 + $0xe8] sm:$0xff]  ;;  %2245 = vst [vmem:[%s3106_s24 + $0xd8] sm:$0xff] %v2244_v23  ;;  %v2250_v45 = vld [vmem:[%s3110_s30 + $0xf0] sm:$0xff] }
 0x473   : >> { %2247 = vst [vmem:[%s3106_s24 + $0xe0] sm:$0xff] %v2246_v10  ;;  %2249 = vst [vmem:[%s3106_s24 + $0xe8] sm:$0xff] %v2248_v44  ;;  %v2252_v59 = vld [vmem:[%s3110_s30 + $0xf8] sm:$0xff]  ;;  %v2254_v37 = vld [vmem:[%s3110_s30 + $0x100] sm:$0xff]  ;;  %2186 = sbr.rel (!%p2183_p12) target bundleno = 1124 (0x464), region = 134 }
 0x474   : >> { %2251 = vst [vmem:[%s3106_s24 + $0xf0] sm:$0xff] %v2250_v45  ;;  %2253 = vst [vmem:[%s3106_s24 + $0xf8] sm:$0xff] %v2252_v59  ;;  %v2256_v13 = vld [vmem:[%s3110_s30 + $0x108] sm:$0xff]  ;;  %v2258_v20 = vld [vmem:[%s3110_s30 + $0x110] sm:$0xff] }
 0x475   : >> { %2255 = vst [vmem:[%s3106_s24 + $0x100] sm:$0xff] %v2254_v37  ;;  %v2260_v36 = vld [vmem:[%s3110_s30 + $0x118] sm:$0xff]  ;;  %2257 = vst [vmem:[%s3106_s24 + $0x108] sm:$0xff] %v2256_v13  ;;  %v2262_v22 = vld [vmem:[%s3110_s30 + $0x120] sm:$0xff] }
 0x476   : >> { %2259 = vst [vmem:[%s3106_s24 + $0x110] sm:$0xff] %v2258_v20  ;;  %2261 = vst [vmem:[%s3106_s24 + $0x118] sm:$0xff] %v2260_v36  ;;  %v2264_v51 = vld [vmem:[%s3110_s30 + $0x128] sm:$0xff]  ;;  %s4154_s30 = smov %s4080_s8 }
 0x477   : >> { %2263 = vst [vmem:[%s3106_s24 + $0x120] sm:$0xff] %v2262_v22  ;;  %2265 = vst [vmem:[%s3106_s24 + $0x128] sm:$0xff] %v2264_v51  ;;  %s4153_s24 = smov %s4083_s9 }
 0x478 PF: > { %3046 = sdivrem.u32 %s4160_s15, 38 }
 0x479   : > { %s2417_s10 = smul.u32 304, %s4007_s29 }
 0x47b   : > { %s2277_s11 = scalar_lea.vmem %s3879_s21, %s2417_s10 [#allocation2]   ;;  %s2279_s12 = scalar_lea.vmem %s4001_s19, %s2417_s10  }
 0x481   : > { %s3047_s13 = spop.drf %3046 }
 0x482   : > { %p2419_p13 = scmp.le.s32.totalorder %s3047_s13, 0 }
 0x483   : > { %s3120_s14 = smov (!%p2419_p13), %s2279_s12   ;;  %s3124_s16 = smov (!%p2419_p13), %s2277_s11  }
 0x484   : > { %2370 = sbr.rel (%p2419_p13) target bundleno = 1169 (0x491), region = 139  ;;  %s3128_s17 = smov (!%p2419_p13), 0  }
 0x485   : > { %s3132_s18 = smov (!%p2419_p13), 0  }
 0x489 LB: >> { %v2289_v41 = vld [vmem:[%s3126_s16] sm:$0xff]  ;;  %s2291_s20 = sadd.s32 1, %s3130_s17  ;;  %s2283_s18 = sadd.s32 1, %s3134_s18   ;;  %s3134_s18 = sphi %s3132_s18, %s2283_s18   ;;  %s3130_s17 = sphi %s3128_s17, %s3129_s17   ;;  %s3126_s16 = sphi %s3124_s16, %s2296_s16   ;;  %s3122_s14 = sphi %s3120_s14, %s2297_s14  }
 0x48a   : >> { %2290 = vst [vmem:[%s3122_s14] sm:$0xff] %v2289_v41  ;;  %p2292_p0 = scmp.ge.s32.totalorder %s2291_s20, %s3047_s13  ;;  %p2282_p1 = scmp.ge.s32.totalorder %s2283_s18, %s3047_s13 }
 0x48c   : >> { %s4164_s20 = smov (%p2292_p0, %s2291_s20), 0  ;;  %2285 = sbr.rel (!%p2282_p1) target bundleno = 1161 (0x489), region = 145 }
 0x48d   : >> { %s2420_s21 = sshll.u32 %s4164_s20, 3  ;;  %s3129_s17 = smov %s4164_s20  }
 0x48e   : >> { %s2296_s16 = scalar_lea.vmem %s2277_s11, %s2420_s21 [#allocation2]   ;;  %s2297_s14 = scalar_lea.vmem %s2279_s12, %s2420_s21  }
 0x491 PF: > { %p13_p2 = scmp.ge.s32.totalorder %s3189_s25, 4   ;;  %s4156_s21 = smov %s3098_s22 }
 0x492   : > { %s4157_s22 = smov %s3197_s28  ;;  %s4158_s23 = smov %s3189_s25 }
 0x493   :  { %15 = sbr.rel (!%p13_p2) target bundleno = 2 (0x2), region = 156 }

</bundles_post_ra>
